<compile_context>
chip_gen: v5e
topology: v5e:2x2
jax: 0.10.0
libtpu: 0.0.40
codegen_flags: <defaults>
</compile_context>

<pallas_src>
import functools
import numpy as np
import jax
import jax.numpy as jnp
from jax.experimental import pallas as pl
from jax.experimental.pallas import tpu as pltpu


def _round_up(x, m):
    return ((x + m - 1) // m) * m


# ----------------------------- Pallas kernels ------------------------------

def _prenet_kernel(y_ref, wa_ref, wb_ref, b_ref, o_ref):
    # y_ref: (1, Tp+1, s*Cin)  phase-reshaped padded input for one batch
    # out  : (1, Tp, HP)       conv output (mask applied later, in WN init)
    tp = o_ref.shape[1]
    y = y_ref[0]
    ya = y[:tp].astype(jnp.bfloat16)
    yb = y[1:tp + 1].astype(jnp.bfloat16)
    h = (jnp.dot(ya, wa_ref[...], preferred_element_type=jnp.float32)
         + jnp.dot(yb, wb_ref[...], preferred_element_type=jnp.float32)
         + b_ref[...])
    o_ref[0] = h


def prenet_layer(xsq, wa, wb, b, tp, hp):
    B, t0, kc = xsq.shape
    return pl.pallas_call(
        _prenet_kernel,
        out_shape=jax.ShapeDtypeStruct((B, tp, hp), jnp.float32),
        grid=(B,),
        in_specs=[pl.BlockSpec((1, t0, kc), lambda bb: (bb, 0, 0)),
                  pl.BlockSpec((kc, hp), lambda bb: (0, 0)),
                  pl.BlockSpec((kc, hp), lambda bb: (0, 0)),
                  pl.BlockSpec((1, hp), lambda bb: (0, 0))],
        out_specs=pl.BlockSpec((1, tp, hp), lambda bb: (bb, 0, 0)),
        compiler_params=pltpu.CompilerParams(
            dimension_semantics=("parallel",)),
    )(xsq, wa, wb, b)


def _cond_kernel(g1_ref, g2_ref, w1_ref, w2_ref, b_ref, o_ref):
    o_ref[...] = (
        jnp.dot(g1_ref[...].astype(jnp.bfloat16), w1_ref[...],
                preferred_element_type=jnp.float32)
        + jnp.dot(g2_ref[...].astype(jnp.bfloat16), w2_ref[...],
                  preferred_element_type=jnp.float32)
        + b_ref[...])


def cond_proj(g1, g2, w1, w2, b):
    B = g1.shape[0]
    N = w1.shape[1]
    return pl.pallas_call(
        _cond_kernel,
        out_shape=jax.ShapeDtypeStruct((B, N), jnp.float32),
    )(g1, g2, w1, w2, b)


def _make_wn_kernel(hp, latp, ksz, n_layers):
    pad = (ksz - 1) // 2

    def kernel(h0_ref, mask_ref, eps_ref, bg_ref, w_in_ref, w_rs_ref, b_rs_ref,
               w_out_ref, b_out_ref, z_ref, m_ref, logs_ref, h_s, skip_s):
        l = pl.program_id(1)
        tp = h_s.shape[0]
        msk = mask_ref[0]                                  # (Tp, 1)

        @pl.when(l == 0)
        def _():
            # x = pre_net(x) * x_mask
            h_s[...] = h0_ref[0] * msk
            skip_s[...] = jnp.zeros(skip_s.shape, skip_s.dtype)

        x = h_s[...]                                       # (Tp, HP) f32

        # in-conv (kernel_size taps, dilation 1) on a halo-padded copy; the
        # halo is zero (matches Conv1d zero padding: padded/masked rows are 0).
        if pad > 0:
            halo = jnp.zeros((pad, hp), jnp.float32)
            xp = jnp.concatenate([halo, x, halo], axis=0)  # (Tp + 2*pad, HP)
        else:
            xp = x
        conv = jnp.zeros((tp, 2 * hp), jnp.float32)
        for k in range(ksz):
            xk = xp[k:k + tp].astype(jnp.bfloat16)
            conv = conv + jnp.dot(xk, w_in_ref[0, k],
                                  preferred_element_type=jnp.float32)
        # per-(batch, layer) bias = in-conv bias + conditioning (g1+g2 proj)
        conv = conv + bg_ref[0, 0]                         # (1, 2HP) broadcast

        acts = jnp.tanh(conv[:, :hp]) * jax.nn.sigmoid(conv[:, hp:])
        rs = (jnp.dot(acts.astype(jnp.bfloat16), w_rs_ref[0],
                      preferred_element_type=jnp.float32) + b_rs_ref[0])

        # residual + mask, skip accumulation (last layer: res half is zero,
        # its full res_skip output lives in the skip half -> matches torch WN)
        h_s[...] = (x + rs[:, :hp]) * msk
        skip_s[...] = skip_s[...] + rs[:, hp:]

        @pl.when(l == n_layers - 1)
        def _():
            wn_out = skip_s[...] * msk                     # WN output * x_mask
            stats = (jnp.dot(wn_out.astype(jnp.bfloat16), w_out_ref[...],
                             preferred_element_type=jnp.float32)
                     + b_out_ref[...])
            m_v = stats[:, :latp]
            logs_v = stats[:, latp:]
            m_ref[0] = m_v
            logs_ref[0] = logs_v
            z_ref[0] = m_v + eps_ref[0] * jnp.exp(logs_v)

    return kernel


def wn_outproj(h0, mask_p, eps, bias_g, w_in, w_rs, b_rs, w_out, b_out,
               *, hp, latp, ksz, n_layers):
    B, tp, _ = h0.shape
    kernel = _make_wn_kernel(hp, latp, ksz, n_layers)
    out_sds = jax.ShapeDtypeStruct((B, tp, latp), jnp.float32)
    z, m, logs = pl.pallas_call(
        kernel,
        out_shape=(out_sds, out_sds, out_sds),
        grid=(B, n_layers),
        in_specs=[
            pl.BlockSpec((1, tp, hp), lambda b, l: (b, 0, 0)),        # h0
            pl.BlockSpec((1, tp, 1), lambda b, l: (b, 0, 0)),         # mask
            pl.BlockSpec((1, tp, latp), lambda b, l: (b, 0, 0)),      # eps
            pl.BlockSpec((1, 1, 1, 2 * hp), lambda b, l: (b, l, 0, 0)),   # bias+g
            pl.BlockSpec((1, ksz, hp, 2 * hp), lambda b, l: (l, 0, 0, 0)),  # w_in
            pl.BlockSpec((1, hp, 2 * hp), lambda b, l: (l, 0, 0)),    # w_rs
            pl.BlockSpec((1, 1, 2 * hp), lambda b, l: (l, 0, 0)),     # b_rs
            pl.BlockSpec((hp, 2 * latp), lambda b, l: (0, 0)),        # w_out
            pl.BlockSpec((1, 2 * latp), lambda b, l: (0, 0)),         # b_out
        ],
        out_specs=(
            pl.BlockSpec((1, tp, latp), lambda b, l: (b, 0, 0)),
            pl.BlockSpec((1, tp, latp), lambda b, l: (b, 0, 0)),
            pl.BlockSpec((1, tp, latp), lambda b, l: (b, 0, 0)),
        ),
        scratch_shapes=[pltpu.VMEM((tp, hp), jnp.float32),   # h (resident)
                        pltpu.VMEM((tp, hp), jnp.float32)],  # skip accumulator
        compiler_params=pltpu.CompilerParams(
            dimension_semantics=("parallel", "arbitrary")),
    )(h0, mask_p, eps, bias_g, w_in, w_rs, b_rs, w_out, b_out)
    return z, m, logs


# ------------------------------- parameters --------------------------------

def init_params(key, in_channels, hidden, latent, kernel_size, n_layers, gin,
                strides):
    """Deterministic synthetic parameters, stored directly in the lane-padded
    layout used by the kernels (valid region zero-padded to 128 lanes)."""
    hp = max(128, _round_up(hidden, 128))
    latp = max(128, _round_up(latent, 128))
    ks = iter(jax.random.split(key, 64))

    def unif(k, shape, fan_in):
        s = 1.0 / np.sqrt(max(fan_in, 1))
        return jax.random.uniform(k, shape, jnp.float32, -s, s)

    col_h_np = np.arange(hp) < hidden
    row_h = jnp.asarray(col_h_np[:, None], jnp.float32)            # (HP,1)
    col_h = jnp.asarray(col_h_np[None, :], jnp.float32)            # (1,HP)
    col2 = jnp.asarray(np.concatenate([col_h_np, col_h_np])[None, :],
                       jnp.float32)                                # (1,2HP)
    skip_only = jnp.asarray(
        np.concatenate([np.zeros(hp, bool), col_h_np])[None, :], jnp.float32)

    p = {'pre': []}
    # pre_net: Conv1d(c_in, hidden, kernel=2s, stride=s, pad=s//2) per stride
    c_in_valid, c_in_store = in_channels, in_channels
    for s in strides:
        kc = s * c_in_store
        rmask = jnp.asarray(
            ((np.arange(kc) % c_in_store) < c_in_valid)[:, None], jnp.float32)
        fan = 2 * s * c_in_valid
        wa = unif(next(ks), (kc, hp), fan) * rmask * col_h
        wb = unif(next(ks), (kc, hp), fan) * rmask * col_h
        b = unif(next(ks), (1, hp), fan) * col_h
        p['pre'].append(dict(wa=wa.astype(jnp.bfloat16),
                             wb=wb.astype(jnp.bfloat16), b=b))
        c_in_valid, c_in_store = hidden, hp

    # dual conditioning 1x1 convs (summed), output 2*hidden*n_layers channels
    cn = 2 * hidden * n_layers
    p['cond_w1'] = unif(next(ks), (gin, cn), gin).astype(jnp.bfloat16)
    p['cond_w2'] = unif(next(ks), (gin, cn), gin).astype(jnp.bfloat16)
    p['cond_b'] = unif(next(ks), (1, cn), gin)

    w_in, b_in, w_rs, b_rs = [], [], [], []
    for l in range(n_layers):
        wi = (unif(next(ks), (kernel_size, hp, 2 * hp), kernel_size * hidden)
              * row_h[None] * col2[None])
        w_in.append(wi)
        b_in.append(unif(next(ks), (2, hp), kernel_size * hidden) * col_h)
        cmask = col2 if l < n_layers - 1 else skip_only
        w_rs.append(unif(next(ks), (hp, 2 * hp), hidden) * row_h * cmask)
        b_rs.append((unif(next(ks), (1, 2 * hp), hidden) * cmask
                     ).reshape(1, 1, 2 * hp))
    p['w_in'] = jnp.stack(w_in).astype(jnp.bfloat16)      # (L,K,HP,2HP)
    p['b_in'] = jnp.stack(b_in)                            # (L,2,HP) f32
    p['w_rs'] = jnp.stack(w_rs).astype(jnp.bfloat16)      # (L,HP,2HP)
    p['b_rs'] = jnp.concatenate(b_rs, axis=0)              # (L,1,2HP) f32

    col_l_np = np.arange(latp) < latent
    col2l = jnp.asarray(np.concatenate([col_l_np, col_l_np])[None, :],
                        jnp.float32)
    p['w_out'] = (unif(next(ks), (hp, 2 * latp), hidden)
                  * row_h * col2l).astype(jnp.bfloat16)
    p['b_out'] = unif(next(ks), (1, 2 * latp), hidden) * col2l
    return p


# ------------------------------- forward pass ------------------------------

def fvae_encoder_forward(params, x, x_mask, g1, g2, eps_key, *,
                         hidden, latent, kernel_size, n_layers, strides):
    """x: (B, Cin, T) NCW; x_mask: (B, 1, T); g1/g2: (B, gin, 1)."""
    hp = max(128, _round_up(hidden, 128))
    latp = max(128, _round_up(latent, 128))
    B, _, T = x.shape
    h_btc = jnp.transpose(x, (0, 2, 1)).astype(jnp.float32)     # (B, T, Cin)

    # ---- pre_net: strided Conv1d stack, one Pallas kernel per stride ----
    t_cur = T
    for i, s in enumerate(strides):
        t_out = (t_cur + 2 * (s // 2) - 2 * s) // s + 1
        tp_i = _round_up(t_out, 8)
        left = s // 2
        total = (tp_i + 1) * s
        keep = min(h_btc.shape[1], total - left)
        xz = jnp.pad(h_btc[:, :keep, :],
                     ((0, 0), (left, total - left - keep), (0, 0)))
        xsq = xz.reshape(B, tp_i + 1, s * xz.shape[-1])          # phase layout
        pr = params['pre'][i]
        h_btc = prenet_layer(xsq, pr['wa'], pr['wb'], pr['b'], tp_i, hp)
        if i < len(strides) - 1 and tp_i != t_out:
            # keep padded rows zero for the next conv's receptive field
            row_ok = (jnp.arange(tp_i) < t_out).astype(jnp.float32)
            h_btc = h_btc * row_ok[None, :, None]
        t_cur = t_out
    t_fin = t_cur
    tp = h_btc.shape[1]

    # ---- mask downsampling exactly like the torch code ----
    ds = int(np.prod(strides))
    mask_ncw = x_mask[:, :, ::ds][:, :, :t_fin]                  # (B,1,T_out)
    mask_btc = jnp.transpose(mask_ncw, (0, 2, 1)).astype(jnp.float32)
    mask_p = jnp.pad(mask_btc, ((0, 0), (0, tp - t_fin), (0, 0)))

    # ---- conditioning: tiny matmul kernel, folded into per-layer biases ----
    g_all = cond_proj(g1[:, :, 0], g2[:, :, 0],
                      params['cond_w1'], params['cond_w2'], params['cond_b'])
    g4 = g_all.reshape(B, n_layers, 2, hidden)
    g4 = jnp.pad(g4, ((0, 0), (0, 0), (0, 0), (0, hp - hidden)))
    bias_g = (g4 + params['b_in'][None]).reshape(B, n_layers, 1, 2 * hp)

    # ---- reparameterization noise (torch.randn_like(m)) ----
    eps = jax.random.normal(eps_key, (B, tp, latp), jnp.float32)

    # ---- fused WN stack + out_proj + reparameterization ----
    z, m, logs = wn_outproj(h_btc, mask_p, eps, bias_g,
                            params['w_in'], params['w_rs'], params['b_rs'],
                            params['w_out'], params['b_out'],
                            hp=hp, latp=latp, ksz=kernel_size,
                            n_layers=n_layers)

    def to_ncw(t):
        return jnp.transpose(t[:, :t_fin, :latent], (0, 2, 1))

    return to_ncw(z), to_ncw(m), to_ncw(logs), mask_ncw


if __name__ == "__main__":
    B, C_in, T = 2, 8, 64
    hidden, latent, kernel_size, n_layers, gin = 32, 8, 5, 3, 16
    strides = (4,)

    root = jax.random.PRNGKey(0)
    k_param, k_x, k_g1, k_g2, k_eps = jax.random.split(root, 5)

    params = init_params(k_param, C_in, hidden, latent, kernel_size,
                         n_layers, gin, strides)

    x = jax.random.normal(k_x, (B, C_in, T), jnp.float32)
    lengths = jnp.array([64, 48])
    x_mask = (jnp.arange(T)[None, None, :] < lengths[:, None, None]
              ).astype(jnp.float32)
    g1 = jax.random.normal(k_g1, (B, gin, 1), jnp.float32)
    g2 = jax.random.normal(k_g2, (B, gin, 1), jnp.float32)

    fwd = jax.jit(functools.partial(
        fvae_encoder_forward, hidden=hidden, latent=latent,
        kernel_size=kernel_size, n_layers=n_layers, strides=strides))
    z, m, logs, mask = fwd(params, x, x_mask, g1, g2, k_eps)
    jax.block_until_ready((z, m, logs, mask))

    T_out = T // int(np.prod(strides))
    assert z.shape == (B, latent, T_out)
    assert m.shape == (B, latent, T_out)
    assert logs.shape == (B, latent, T_out)
    assert mask.shape == (B, 1, T_out)
    assert bool(jnp.all(jnp.isfinite(z)))
    assert bool(jnp.all(jnp.isfinite(m)))
    assert bool(jnp.all(jnp.isfinite(logs)))
    print("KERNEL_OK")
</pallas_src>

<mosaic_0001>
module attributes {stable_mosaic.version = 11 : i64} {
  func.func @_prenet_kernel(%arg0: i32, %arg1: memref<1x17x32xf32, #tpu.memory_space<vmem>>, %arg2: memref<32x128xbf16, #tpu.memory_space<vmem>>, %arg3: memref<32x128xbf16, #tpu.memory_space<vmem>>, %arg4: memref<1x128xf32, #tpu.memory_space<vmem>>, %arg5: memref<1x16x128xf32, #tpu.memory_space<vmem>>) attributes {dimension_semantics = [#tpu.dimension_semantics<parallel>], iteration_bounds = array<i64: 2>, scalar_prefetch = 0 : i64, scratch_operands = 0 : i64, tpu.core_type = #tpu.core_type<tc>, window_params = [{transform_indices = @transform_0, window_bounds = array<i64: 1, 17, 32>}, {pipeline_mode = #tpu.pipeline_mode<synchronous>, transform_indices = @transform_1, window_bounds = array<i64: 32, 128>}, {pipeline_mode = #tpu.pipeline_mode<synchronous>, transform_indices = @transform_2, window_bounds = array<i64: 32, 128>}, {pipeline_mode = #tpu.pipeline_mode<synchronous>, transform_indices = @transform_3, window_bounds = array<i64: 1, 128>}, {transform_indices = @transform_4, window_bounds = array<i64: 1, 16, 128>}]} {
    %c0 = arith.constant 0 : index
    %c0_0 = arith.constant 0 : index
    %c0_1 = arith.constant 0 : index
    %0 = vector.load %arg1[%c0, %c0_0, %c0_1] : memref<1x17x32xf32, #tpu.memory_space<vmem>>, vector<1x17x32xf32>
    %1 = vector.shape_cast %0 : vector<1x17x32xf32> to vector<17x32xf32>
    %2 = vector.extract_strided_slice %1 {offsets = [0, 0], sizes = [16, 32], strides = [1, 1]} : vector<17x32xf32> to vector<16x32xf32>
    %3 = arith.truncf %2 : vector<16x32xf32> to vector<16x32xbf16>
    %4 = vector.extract_strided_slice %1 {offsets = [1, 0], sizes = [16, 32], strides = [1, 1]} : vector<17x32xf32> to vector<16x32xf32>
    %5 = arith.truncf %4 : vector<16x32xf32> to vector<16x32xbf16>
    %c0_2 = arith.constant 0 : index
    %c0_3 = arith.constant 0 : index
    %6 = vector.load %arg2[%c0_2, %c0_3] : memref<32x128xbf16, #tpu.memory_space<vmem>>, vector<32x128xbf16>
    %cst = arith.constant dense<0.000000e+00> : vector<16x128xf32>
    %7 = tpu.matmul %3, %6, %cst {dimension_numbers = #tpu.dot_dimension_numbers<[1], [0], [0], [1], [0, 0, 1, 1], [], []>} : vector<16x32xbf16>, vector<32x128xbf16>, vector<16x128xf32> -> vector<16x128xf32>
    %c0_4 = arith.constant 0 : index
    %c0_5 = arith.constant 0 : index
    %8 = vector.load %arg3[%c0_4, %c0_5] : memref<32x128xbf16, #tpu.memory_space<vmem>>, vector<32x128xbf16>
    %cst_6 = arith.constant dense<0.000000e+00> : vector<16x128xf32>
    %9 = tpu.matmul %5, %8, %cst_6 {dimension_numbers = #tpu.dot_dimension_numbers<[1], [0], [0], [1], [0, 0, 1, 1], [], []>} : vector<16x32xbf16>, vector<32x128xbf16>, vector<16x128xf32> -> vector<16x128xf32>
    %10 = arith.addf %7, %9 : vector<16x128xf32>
    %c0_7 = arith.constant 0 : index
    %c0_8 = arith.constant 0 : index
    %11 = vector.load %arg4[%c0_7, %c0_8] : memref<1x128xf32, #tpu.memory_space<vmem>>, vector<1x128xf32>
    %12 = vector.broadcast %11 : vector<1x128xf32> to vector<16x128xf32>
    %13 = arith.addf %10, %12 : vector<16x128xf32>
    %c0_9 = arith.constant 0 : index
    %c0_10 = arith.constant 0 : index
    %c0_11 = arith.constant 0 : index
    %14 = vector.load %arg5[%c0_9, %c0_10, %c0_11] : memref<1x16x128xf32, #tpu.memory_space<vmem>>, vector<1x16x128xf32>
    %15 = vector.shape_cast %14 : vector<1x16x128xf32> to vector<16x128xf32>
    %16 = vector.shape_cast %13 : vector<16x128xf32> to vector<1x16x128xf32>
    tpu.vector_store %arg5[%c0_9, %c0_10, %c0_11], %16 {strides = array<i32>} : memref<1x16x128xf32, #tpu.memory_space<vmem>>, vector<1x16x128xf32>,
    return
  }
  func.func @transform_0(%arg0: i32) -> (i32, i32, i32) {
    %c0_i32 = arith.constant 0 : i32
    %c0_i32_0 = arith.constant 0 : i32
    %c0_i32_1 = arith.constant 0 : i32
    return %arg0, %c0_i32, %c0_i32_0 : i32, i32, i32
  }
  func.func @transform_1(%arg0: i32) -> (i32, i32) {
    %c0_i32 = arith.constant 0 : i32
    %c0_i32_0 = arith.constant 0 : i32
    %c0_i32_1 = arith.constant 0 : i32
    return %c0_i32, %c0_i32_0 : i32, i32
  }
  func.func @transform_2(%arg0: i32) -> (i32, i32) {
    %c0_i32 = arith.constant 0 : i32
    %c0_i32_0 = arith.constant 0 : i32
    %c0_i32_1 = arith.constant 0 : i32
    return %c0_i32, %c0_i32_0 : i32, i32
  }
  func.func @transform_3(%arg0: i32) -> (i32, i32) {
    %c0_i32 = arith.constant 0 : i32
    %c0_i32_0 = arith.constant 0 : i32
    %c0_i32_1 = arith.constant 0 : i32
    return %c0_i32, %c0_i32_0 : i32, i32
  }
  func.func @transform_4(%arg0: i32) -> (i32, i32, i32) {
    %c0_i32 = arith.constant 0 : i32
    %c0_i32_0 = arith.constant 0 : i32
    %c0_i32_1 = arith.constant 0 : i32
    return %arg0, %c0_i32, %c0_i32_0 : i32, i32, i32
  }
}

module attributes {stable_mosaic.version = 11 : i64} {
  func.func @_cond_kernel(%arg0: memref<2x16xf32, #tpu.memory_space<vmem>>, %arg1: memref<2x16xf32, #tpu.memory_space<vmem>>, %arg2: memref<16x192xbf16, #tpu.memory_space<vmem>>, %arg3: memref<16x192xbf16, #tpu.memory_space<vmem>>, %arg4: memref<1x192xf32, #tpu.memory_space<vmem>>, %arg5: memref<2x192xf32, #tpu.memory_space<vmem>>) attributes {dimension_semantics = [], scalar_prefetch = 0 : i64, scratch_operands = 0 : i64, tpu.core_type = #tpu.core_type<tc>} {
    %c0 = arith.constant 0 : index
    %c0_0 = arith.constant 0 : index
    %0 = vector.load %arg0[%c0, %c0_0] : memref<2x16xf32, #tpu.memory_space<vmem>>, vector<2x16xf32>
    %1 = arith.truncf %0 : vector<2x16xf32> to vector<2x16xbf16>
    %c0_1 = arith.constant 0 : index
    %c0_2 = arith.constant 0 : index
    %2 = vector.load %arg2[%c0_1, %c0_2] : memref<16x192xbf16, #tpu.memory_space<vmem>>, vector<16x192xbf16>
    %cst = arith.constant dense<0.000000e+00> : vector<2x192xf32>
    %3 = tpu.matmul %1, %2, %cst {dimension_numbers = #tpu.dot_dimension_numbers<[1], [0], [0], [1], [0, 0, 1, 1], [], []>} : vector<2x16xbf16>, vector<16x192xbf16>, vector<2x192xf32> -> vector<2x192xf32>
    %c0_3 = arith.constant 0 : index
    %c0_4 = arith.constant 0 : index
    %4 = vector.load %arg1[%c0_3, %c0_4] : memref<2x16xf32, #tpu.memory_space<vmem>>, vector<2x16xf32>
    %5 = arith.truncf %4 : vector<2x16xf32> to vector<2x16xbf16>
    %c0_5 = arith.constant 0 : index
    %c0_6 = arith.constant 0 : index
    %6 = vector.load %arg3[%c0_5, %c0_6] : memref<16x192xbf16, #tpu.memory_space<vmem>>, vector<16x192xbf16>
    %cst_7 = arith.constant dense<0.000000e+00> : vector<2x192xf32>
    %7 = tpu.matmul %5, %6, %cst_7 {dimension_numbers = #tpu.dot_dimension_numbers<[1], [0], [0], [1], [0, 0, 1, 1], [], []>} : vector<2x16xbf16>, vector<16x192xbf16>, vector<2x192xf32> -> vector<2x192xf32>
    %8 = arith.addf %3, %7 : vector<2x192xf32>
    %c0_8 = arith.constant 0 : index
    %c0_9 = arith.constant 0 : index
    %9 = vector.load %arg4[%c0_8, %c0_9] : memref<1x192xf32, #tpu.memory_space<vmem>>, vector<1x192xf32>
    %10 = vector.broadcast %9 : vector<1x192xf32> to vector<2x192xf32>
    %11 = arith.addf %8, %10 : vector<2x192xf32>
    %c0_10 = arith.constant 0 : index
    %c0_11 = arith.constant 0 : index
    %12 = vector.load %arg5[%c0_10, %c0_11] : memref<2x192xf32, #tpu.memory_space<vmem>>, vector<2x192xf32>
    tpu.vector_store %arg5[%c0_10, %c0_11], %11 {strides = array<i32>} : memref<2x192xf32, #tpu.memory_space<vmem>>, vector<2x192xf32>,
    return
  }
}

module attributes {stable_mosaic.version = 11 : i64} {
  func.func @kernel(%arg0: i32, %arg1: i32, %arg2: memref<1x16x128xf32, #tpu.memory_space<vmem>>, %arg3: memref<1x16x1xf32, #tpu.memory_space<vmem>>, %arg4: memref<1x16x128xf32, #tpu.memory_space<vmem>>, %arg5: memref<1x1x1x256xf32, #tpu.memory_space<vmem>>, %arg6: memref<1x5x128x256xbf16, #tpu.memory_space<vmem>>, %arg7: memref<1x128x256xbf16, #tpu.memory_space<vmem>>, %arg8: memref<1x1x256xf32, #tpu.memory_space<vmem>>, %arg9: memref<128x256xbf16, #tpu.memory_space<vmem>>, %arg10: memref<1x256xf32, #tpu.memory_space<vmem>>, %arg11: memref<1x16x128xf32, #tpu.memory_space<vmem>>, %arg12: memref<1x16x128xf32, #tpu.memory_space<vmem>>, %arg13: memref<1x16x128xf32, #tpu.memory_space<vmem>>, %arg14: memref<16x128xf32, #tpu.memory_space<vmem>>, %arg15: memref<16x128xf32, #tpu.memory_space<vmem>>) attributes {dimension_semantics = [#tpu.dimension_semantics<parallel>, #tpu.dimension_semantics<arbitrary>], iteration_bounds = array<i64: 2, 3>, scalar_prefetch = 0 : i64, scratch_operands = 2 : i64, tpu.core_type = #tpu.core_type<tc>, window_params = [{transform_indices = @transform_0, window_bounds = array<i64: 1, 16, 128>}, {transform_indices = @transform_1, window_bounds = array<i64: 1, 16, 1>}, {transform_indices = @transform_2, window_bounds = array<i64: 1, 16, 128>}, {transform_indices = @transform_3, window_bounds = array<i64: 1, 1, 1, 256>}, {transform_indices = @transform_4, window_bounds = array<i64: 1, 5, 128, 256>}, {transform_indices = @transform_5, window_bounds = array<i64: 1, 128, 256>}, {transform_indices = @transform_6, window_bounds = array<i64: 1, 1, 256>}, {pipeline_mode = #tpu.pipeline_mode<synchronous>, transform_indices = @transform_7, window_bounds = array<i64: 128, 256>}, {pipeline_mode = #tpu.pipeline_mode<synchronous>, transform_indices = @transform_8, window_bounds = array<i64: 1, 256>}, {transform_indices = @transform_9, window_bounds = array<i64: 1, 16, 128>}, {transform_indices = @transform_10, window_bounds = array<i64: 1, 16, 128>}, {transform_indices = @transform_11, window_bounds = array<i64: 1, 16, 128>}]} {
    %c0 = arith.constant 0 : index
    %c0_0 = arith.constant 0 : index
    %c0_1 = arith.constant 0 : index
    %0 = vector.load %arg3[%c0, %c0_0, %c0_1] : memref<1x16x1xf32, #tpu.memory_space<vmem>>, vector<1x16x1xf32>
    %1 = vector.shape_cast %0 : vector<1x16x1xf32> to vector<16x1xf32>
    %c0_i32 = arith.constant 0 : i32
    %2 = arith.cmpi eq, %arg1, %c0_i32 : i32
    %3 = arith.extui %2 : i1 to i32
    %c0_i32_2 = arith.constant 0 : i32
    %4 = arith.cmpi ne, %3, %c0_i32_2 : i32
    scf.if %4 {
      %c0_46 = arith.constant 0 : index
      %c0_47 = arith.constant 0 : index
      %c0_48 = arith.constant 0 : index
      %72 = vector.load %arg2[%c0_46, %c0_47, %c0_48] : memref<1x16x128xf32, #tpu.memory_space<vmem>>, vector<1x16x128xf32>
      %73 = vector.shape_cast %72 : vector<1x16x128xf32> to vector<16x128xf32>
      %74 = vector.broadcast %1 : vector<16x1xf32> to vector<16x128xf32>
      %75 = arith.mulf %73, %74 : vector<16x128xf32>
      %c0_49 = arith.constant 0 : index
      %c0_50 = arith.constant 0 : index
      %76 = vector.load %arg14[%c0_49, %c0_50] : memref<16x128xf32, #tpu.memory_space<vmem>>, vector<16x128xf32>
      tpu.vector_store %arg14[%c0_49, %c0_50], %75 {strides = array<i32>} : memref<16x128xf32, #tpu.memory_space<vmem>>, vector<16x128xf32>,
      %cst_51 = arith.constant 0.000000e+00 : f32
      %77 = vector.broadcast %cst_51 : f32 to vector<16x128xf32>
      %c0_52 = arith.constant 0 : index
      %c0_53 = arith.constant 0 : index
      %78 = vector.load %arg15[%c0_52, %c0_53] : memref<16x128xf32, #tpu.memory_space<vmem>>, vector<16x128xf32>
      tpu.vector_store %arg15[%c0_52, %c0_53], %77 {strides = array<i32>} : memref<16x128xf32, #tpu.memory_space<vmem>>, vector<16x128xf32>,
    } else {
    }
    %c0_3 = arith.constant 0 : index
    %c0_4 = arith.constant 0 : index
    %5 = vector.load %arg14[%c0_3, %c0_4] : memref<16x128xf32, #tpu.memory_space<vmem>>, vector<16x128xf32>
    %cst = arith.constant 0.000000e+00 : f32
    %6 = vector.broadcast %cst : f32 to vector<2x128xf32>
    %7 = tpu.concatenate %6, %5, %6 in 0 : vector<2x128xf32>, vector<16x128xf32>, vector<2x128xf32> -> vector<20x128xf32>
    %cst_5 = arith.constant 0.000000e+00 : f32
    %8 = vector.broadcast %cst_5 : f32 to vector<16x256xf32>
    %9 = vector.extract_strided_slice %7 {offsets = [0, 0], sizes = [16, 128], strides = [1, 1]} : vector<20x128xf32> to vector<16x128xf32>
    %10 = arith.truncf %9 : vector<16x128xf32> to vector<16x128xbf16>
    %c0_6 = arith.constant 0 : index
    %c0_7 = arith.constant 0 : index
    %c0_8 = arith.constant 0 : index
    %c0_9 = arith.constant 0 : index
    %11 = vector.load %arg6[%c0_6, %c0_7, %c0_8, %c0_9] : memref<1x5x128x256xbf16, #tpu.memory_space<vmem>>, vector<1x1x128x256xbf16>
    %12 = vector.shape_cast %11 : vector<1x1x128x256xbf16> to vector<128x256xbf16>
    %cst_10 = arith.constant dense<0.000000e+00> : vector<16x256xf32>
    %13 = tpu.matmul %10, %12, %cst_10 {dimension_numbers = #tpu.dot_dimension_numbers<[1], [0], [0], [1], [0, 0, 1, 1], [], []>} : vector<16x128xbf16>, vector<128x256xbf16>, vector<16x256xf32> -> vector<16x256xf32>
    %14 = arith.addf %8, %13 : vector<16x256xf32>
    %15 = vector.extract_strided_slice %7 {offsets = [1, 0], sizes = [16, 128], strides = [1, 1]} : vector<20x128xf32> to vector<16x128xf32>
    %16 = arith.truncf %15 : vector<16x128xf32> to vector<16x128xbf16>
    %c0_11 = arith.constant 0 : index
    %c1 = arith.constant 1 : index
    %c0_12 = arith.constant 0 : index
    %c0_13 = arith.constant 0 : index
    %17 = vector.load %arg6[%c0_11, %c1, %c0_12, %c0_13] : memref<1x5x128x256xbf16, #tpu.memory_space<vmem>>, vector<1x1x128x256xbf16>
    %18 = vector.shape_cast %17 : vector<1x1x128x256xbf16> to vector<128x256xbf16>
    %cst_14 = arith.constant dense<0.000000e+00> : vector<16x256xf32>
    %19 = tpu.matmul %16, %18, %cst_14 {dimension_numbers = #tpu.dot_dimension_numbers<[1], [0], [0], [1], [0, 0, 1, 1], [], []>} : vector<16x128xbf16>, vector<128x256xbf16>, vector<16x256xf32> -> vector<16x256xf32>
    %20 = arith.addf %14, %19 : vector<16x256xf32>
    %21 = vector.extract_strided_slice %7 {offsets = [2, 0], sizes = [16, 128], strides = [1, 1]} : vector<20x128xf32> to vector<16x128xf32>
    %22 = arith.truncf %21 : vector<16x128xf32> to vector<16x128xbf16>
    %c0_15 = arith.constant 0 : index
    %c2 = arith.constant 2 : index
    %c0_16 = arith.constant 0 : index
    %c0_17 = arith.constant 0 : index
    %23 = vector.load %arg6[%c0_15, %c2, %c0_16, %c0_17] : memref<1x5x128x256xbf16, #tpu.memory_space<vmem>>, vector<1x1x128x256xbf16>
    %24 = vector.shape_cast %23 : vector<1x1x128x256xbf16> to vector<128x256xbf16>
    %cst_18 = arith.constant dense<0.000000e+00> : vector<16x256xf32>
    %25 = tpu.matmul %22, %24, %cst_18 {dimension_numbers = #tpu.dot_dimension_numbers<[1], [0], [0], [1], [0, 0, 1, 1], [], []>} : vector<16x128xbf16>, vector<128x256xbf16>, vector<16x256xf32> -> vector<16x256xf32>
    %26 = arith.addf %20, %25 : vector<16x256xf32>
    %27 = vector.extract_strided_slice %7 {offsets = [3, 0], sizes = [16, 128], strides = [1, 1]} : vector<20x128xf32> to vector<16x128xf32>
    %28 = arith.truncf %27 : vector<16x128xf32> to vector<16x128xbf16>
    %c0_19 = arith.constant 0 : index
    %c3 = arith.constant 3 : index
    %c0_20 = arith.constant 0 : index
    %c0_21 = arith.constant 0 : index
    %29 = vector.load %arg6[%c0_19, %c3, %c0_20, %c0_21] : memref<1x5x128x256xbf16, #tpu.memory_space<vmem>>, vector<1x1x128x256xbf16>
    %30 = vector.shape_cast %29 : vector<1x1x128x256xbf16> to vector<128x256xbf16>
    %cst_22 = arith.constant dense<0.000000e+00> : vector<16x256xf32>
    %31 = tpu.matmul %28, %30, %cst_22 {dimension_numbers = #tpu.dot_dimension_numbers<[1], [0], [0], [1], [0, 0, 1, 1], [], []>} : vector<16x128xbf16>, vector<128x256xbf16>, vector<16x256xf32> -> vector<16x256xf32>
    %32 = arith.addf %26, %31 : vector<16x256xf32>
    %33 = vector.extract_strided_slice %7 {offsets = [4, 0], sizes = [16, 128], strides = [1, 1]} : vector<20x128xf32> to vector<16x128xf32>
    %34 = arith.truncf %33 : vector<16x128xf32> to vector<16x128xbf16>
    %c0_23 = arith.constant 0 : index
    %c4 = arith.constant 4 : index
    %c0_24 = arith.constant 0 : index
    %c0_25 = arith.constant 0 : index
    %35 = vector.load %arg6[%c0_23, %c4, %c0_24, %c0_25] : memref<1x5x128x256xbf16, #tpu.memory_space<vmem>>, vector<1x1x128x256xbf16>
    %36 = vector.shape_cast %35 : vector<1x1x128x256xbf16> to vector<128x256xbf16>
    %cst_26 = arith.constant dense<0.000000e+00> : vector<16x256xf32>
    %37 = tpu.matmul %34, %36, %cst_26 {dimension_numbers = #tpu.dot_dimension_numbers<[1], [0], [0], [1], [0, 0, 1, 1], [], []>} : vector<16x128xbf16>, vector<128x256xbf16>, vector<16x256xf32> -> vector<16x256xf32>
    %38 = arith.addf %32, %37 : vector<16x256xf32>
    %c0_27 = arith.constant 0 : index
    %c0_28 = arith.constant 0 : index
    %c0_29 = arith.constant 0 : index
    %c0_30 = arith.constant 0 : index
    %39 = vector.load %arg5[%c0_27, %c0_28, %c0_29, %c0_30] : memref<1x1x1x256xf32, #tpu.memory_space<vmem>>, vector<1x1x1x256xf32>
    %40 = vector.shape_cast %39 : vector<1x1x1x256xf32> to vector<1x256xf32>
    %41 = vector.broadcast %40 : vector<1x256xf32> to vector<16x256xf32>
    %42 = arith.addf %38, %41 : vector<16x256xf32>
    %43 = vector.extract_strided_slice %42 {offsets = [0, 0], sizes = [16, 128], strides = [1, 1]} : vector<16x256xf32> to vector<16x128xf32>
    %44 = math.tanh %43 : vector<16x128xf32>
    %45 = vector.extract_strided_slice %42 {offsets = [0, 128], sizes = [16, 128], strides = [1, 1]} : vector<16x256xf32> to vector<16x128xf32>
    %46 = arith.negf %45 : vector<16x128xf32>
    %47 = math.exp %46 : vector<16x128xf32>
    %cst_31 = arith.constant 1.000000e+00 : f32
    %48 = vector.broadcast %cst_31 : f32 to vector<16x128xf32>
    %49 = arith.addf %48, %47 : vector<16x128xf32>
    %50 = arith.divf %48, %49 : vector<16x128xf32>
    %51 = arith.mulf %44, %50 : vector<16x128xf32>
    %52 = arith.truncf %51 : vector<16x128xf32> to vector<16x128xbf16>
    %c0_32 = arith.constant 0 : index
    %c0_33 = arith.constant 0 : index
    %c0_34 = arith.constant 0 : index
    %53 = vector.load %arg7[%c0_32, %c0_33, %c0_34] : memref<1x128x256xbf16, #tpu.memory_space<vmem>>, vector<1x128x256xbf16>
    %54 = vector.shape_cast %53 : vector<1x128x256xbf16> to vector<128x256xbf16>
    %cst_35 = arith.constant dense<0.000000e+00> : vector<16x256xf32>
    %55 = tpu.matmul %52, %54, %cst_35 {dimension_numbers = #tpu.dot_dimension_numbers<[1], [0], [0], [1], [0, 0, 1, 1], [], []>} : vector<16x128xbf16>, vector<128x256xbf16>, vector<16x256xf32> -> vector<16x256xf32>
    %c0_36 = arith.constant 0 : index
    %c0_37 = arith.constant 0 : index
    %c0_38 = arith.constant 0 : index
    %56 = vector.load %arg8[%c0_36, %c0_37, %c0_38] : memref<1x1x256xf32, #tpu.memory_space<vmem>>, vector<1x1x256xf32>
    %57 = vector.shape_cast %56 : vector<1x1x256xf32> to vector<1x256xf32>
    %58 = vector.broadcast %57 : vector<1x256xf32> to vector<16x256xf32>
    %59 = arith.addf %55, %58 : vector<16x256xf32>
    %60 = vector.extract_strided_slice %59 {offsets = [0, 0], sizes = [16, 128], strides = [1, 1]} : vector<16x256xf32> to vector<16x128xf32>
    %61 = arith.addf %5, %60 : vector<16x128xf32>
    %62 = vector.broadcast %1 : vector<16x1xf32> to vector<16x128xf32>
    %63 = arith.mulf %61, %62 : vector<16x128xf32>
    %c0_39 = arith.constant 0 : index
    %c0_40 = arith.constant 0 : index
    %64 = vector.load %arg14[%c0_39, %c0_40] : memref<16x128xf32, #tpu.memory_space<vmem>>, vector<16x128xf32>
    tpu.vector_store %arg14[%c0_39, %c0_40], %63 {strides = array<i32>} : memref<16x128xf32, #tpu.memory_space<vmem>>, vector<16x128xf32>,
    %c0_41 = arith.constant 0 : index
    %c0_42 = arith.constant 0 : index
    %65 = vector.load %arg15[%c0_41, %c0_42] : memref<16x128xf32, #tpu.memory_space<vmem>>, vector<16x128xf32>
    %66 = vector.extract_strided_slice %59 {offsets = [0, 128], sizes = [16, 128], strides = [1, 1]} : vector<16x256xf32> to vector<16x128xf32>
    %67 = arith.addf %65, %66 : vector<16x128xf32>
    %c0_43 = arith.constant 0 : index
    %c0_44 = arith.constant 0 : index
    %68 = vector.load %arg15[%c0_43, %c0_44] : memref<16x128xf32, #tpu.memory_space<vmem>>, vector<16x128xf32>
    tpu.vector_store %arg15[%c0_43, %c0_44], %67 {strides = array<i32>} : memref<16x128xf32, #tpu.memory_space<vmem>>, vector<16x128xf32>,
    %c2_i32 = arith.constant 2 : i32
    %69 = arith.cmpi eq, %arg1, %c2_i32 : i32
    %70 = arith.extui %69 : i1 to i32
    %c0_i32_45 = arith.constant 0 : i32
    %71 = arith.cmpi ne, %70, %c0_i32_45 : i32
    scf.if %71 {
      %c0_46 = arith.constant 0 : index
      %c0_47 = arith.constant 0 : index
      %72 = vector.load %arg15[%c0_46, %c0_47] : memref<16x128xf32, #tpu.memory_space<vmem>>, vector<16x128xf32>
      %73 = vector.broadcast %1 : vector<16x1xf32> to vector<16x128xf32>
      %74 = arith.mulf %72, %73 : vector<16x128xf32>
      %75 = arith.truncf %74 : vector<16x128xf32> to vector<16x128xbf16>
      %c0_48 = arith.constant 0 : index
      %c0_49 = arith.constant 0 : index
      %76 = vector.load %arg9[%c0_48, %c0_49] : memref<128x256xbf16, #tpu.memory_space<vmem>>, vector<128x256xbf16>
      %cst_50 = arith.constant dense<0.000000e+00> : vector<16x256xf32>
      %77 = tpu.matmul %75, %76, %cst_50 {dimension_numbers = #tpu.dot_dimension_numbers<[1], [0], [0], [1], [0, 0, 1, 1], [], []>} : vector<16x128xbf16>, vector<128x256xbf16>, vector<16x256xf32> -> vector<16x256xf32>
      %c0_51 = arith.constant 0 : index
      %c0_52 = arith.constant 0 : index
      %78 = vector.load %arg10[%c0_51, %c0_52] : memref<1x256xf32, #tpu.memory_space<vmem>>, vector<1x256xf32>
      %79 = vector.broadcast %78 : vector<1x256xf32> to vector<16x256xf32>
      %80 = arith.addf %77, %79 : vector<16x256xf32>
      %81 = vector.extract_strided_slice %80 {offsets = [0, 0], sizes = [16, 128], strides = [1, 1]} : vector<16x256xf32> to vector<16x128xf32>
      %82 = vector.extract_strided_slice %80 {offsets = [0, 128], sizes = [16, 128], strides = [1, 1]} : vector<16x256xf32> to vector<16x128xf32>
      %c0_53 = arith.constant 0 : index
      %c0_54 = arith.constant 0 : index
      %c0_55 = arith.constant 0 : index
      %83 = vector.load %arg12[%c0_53, %c0_54, %c0_55] : memref<1x16x128xf32, #tpu.memory_space<vmem>>, vector<1x16x128xf32>
      %84 = vector.shape_cast %83 : vector<1x16x128xf32> to vector<16x128xf32>
      %85 = vector.shape_cast %81 : vector<16x128xf32> to vector<1x16x128xf32>
      tpu.vector_store %arg12[%c0_53, %c0_54, %c0_55], %85 {strides = array<i32>} : memref<1x16x128xf32, #tpu.memory_space<vmem>>, vector<1x16x128xf32>,
      %c0_56 = arith.constant 0 : index
      %c0_57 = arith.constant 0 : index
      %c0_58 = arith.constant 0 : index
      %86 = vector.load %arg13[%c0_56, %c0_57, %c0_58] : memref<1x16x128xf32, #tpu.memory_space<vmem>>, vector<1x16x128xf32>
      %87 = vector.shape_cast %86 : vector<1x16x128xf32> to vector<16x128xf32>
      %88 = vector.shape_cast %82 : vector<16x128xf32> to vector<1x16x128xf32>
      tpu.vector_store %arg13[%c0_56, %c0_57, %c0_58], %88 {strides = array<i32>} : memref<1x16x128xf32, #tpu.memory_space<vmem>>, vector<1x16x128xf32>,
      %c0_59 = arith.constant 0 : index
      %c0_60 = arith.constant 0 : index
      %c0_61 = arith.constant 0 : index
      %89 = vector.load %arg4[%c0_59, %c0_60, %c0_61] : memref<1x16x128xf32, #tpu.memory_space<vmem>>, vector<1x16x128xf32>
      %90 = vector.shape_cast %89 : vector<1x16x128xf32> to vector<16x128xf32>
      %91 = math.exp %82 : vector<16x128xf32>
      %92 = arith.mulf %90, %91 : vector<16x128xf32>
      %93 = arith.addf %81, %92 : vector<16x128xf32>
      %c0_62 = arith.constant 0 : index
      %c0_63 = arith.constant 0 : index
      %c0_64 = arith.constant 0 : index
      %94 = vector.load %arg11[%c0_62, %c0_63, %c0_64] : memref<1x16x128xf32, #tpu.memory_space<vmem>>, vector<1x16x128xf32>
      %95 = vector.shape_cast %94 : vector<1x16x128xf32> to vector<16x128xf32>
      %96 = vector.shape_cast %93 : vector<16x128xf32> to vector<1x16x128xf32>
      tpu.vector_store %arg11[%c0_62, %c0_63, %c0_64], %96 {strides = array<i32>} : memref<1x16x128xf32, #tpu.memory_space<vmem>>, vector<1x16x128xf32>,
    } else {
    }
    return
  }
  func.func @transform_0(%arg0: i32, %arg1: i32) -> (i32, i32, i32) {
    %c0_i32 = arith.constant 0 : i32
    %c0_i32_0 = arith.constant 0 : i32
    %c0_i32_1 = arith.constant 0 : i32
    return %arg0, %c0_i32, %c0_i32_0 : i32, i32, i32
  }
  func.func @transform_1(%arg0: i32, %arg1: i32) -> (i32, i32, i32) {
    %c0_i32 = arith.constant 0 : i32
    %c0_i32_0 = arith.constant 0 : i32
    %c0_i32_1 = arith.constant 0 : i32
    return %arg0, %c0_i32, %c0_i32_0 : i32, i32, i32
  }
  func.func @transform_2(%arg0: i32, %arg1: i32) -> (i32, i32, i32) {
    %c0_i32 = arith.constant 0 : i32
    %c0_i32_0 = arith.constant 0 : i32
    %c0_i32_1 = arith.constant 0 : i32
    return %arg0, %c0_i32, %c0_i32_0 : i32, i32, i32
  }
  func.func @transform_3(%arg0: i32, %arg1: i32) -> (i32, i32, i32, i32) {
    %c0_i32 = arith.constant 0 : i32
    %c0_i32_0 = arith.constant 0 : i32
    %c0_i32_1 = arith.constant 0 : i32
    return %arg0, %arg1, %c0_i32, %c0_i32_0 : i32, i32, i32, i32
  }
  func.func @transform_4(%arg0: i32, %arg1: i32) -> (i32, i32, i32, i32) {
    %c0_i32 = arith.constant 0 : i32
    %c0_i32_0 = arith.constant 0 : i32
    %c0_i32_1 = arith.constant 0 : i32
    %c0_i32_2 = arith.constant 0 : i32
    return %arg1, %c0_i32, %c0_i32_0, %c0_i32_1 : i32, i32, i32, i32
  }
  func.func @transform_5(%arg0: i32, %arg1: i32) -> (i32, i32, i32) {
    %c0_i32 = arith.constant 0 : i32
    %c0_i32_0 = arith.constant 0 : i32
    %c0_i32_1 = arith.constant 0 : i32
    return %arg1, %c0_i32, %c0_i32_0 : i32, i32, i32
  }
  func.func @transform_6(%arg0: i32, %arg1: i32) -> (i32, i32, i32) {
    %c0_i32 = arith.constant 0 : i32
    %c0_i32_0 = arith.constant 0 : i32
    %c0_i32_1 = arith.constant 0 : i32
    return %arg1, %c0_i32, %c0_i32_0 : i32, i32, i32
  }
  func.func @transform_7(%arg0: i32, %arg1: i32) -> (i32, i32) {
    %c0_i32 = arith.constant 0 : i32
    %c0_i32_0 = arith.constant 0 : i32
    %c0_i32_1 = arith.constant 0 : i32
    return %c0_i32, %c0_i32_0 : i32, i32
  }
  func.func @transform_8(%arg0: i32, %arg1: i32) -> (i32, i32) {
    %c0_i32 = arith.constant 0 : i32
    %c0_i32_0 = arith.constant 0 : i32
    %c0_i32_1 = arith.constant 0 : i32
    return %c0_i32, %c0_i32_0 : i32, i32
  }
  func.func @transform_9(%arg0: i32, %arg1: i32) -> (i32, i32, i32) {
    %c0_i32 = arith.constant 0 : i32
    %c0_i32_0 = arith.constant 0 : i32
    %c0_i32_1 = arith.constant 0 : i32
    return %arg0, %c0_i32, %c0_i32_0 : i32, i32, i32
  }
  func.func @transform_10(%arg0: i32, %arg1: i32) -> (i32, i32, i32) {
    %c0_i32 = arith.constant 0 : i32
    %c0_i32_0 = arith.constant 0 : i32
    %c0_i32_1 = arith.constant 0 : i32
    return %arg0, %c0_i32, %c0_i32_0 : i32, i32, i32
  }
  func.func @transform_11(%arg0: i32, %arg1: i32) -> (i32, i32, i32) {
    %c0_i32 = arith.constant 0 : i32
    %c0_i32_0 = arith.constant 0 : i32
    %c0_i32_1 = arith.constant 0 : i32
    return %arg0, %c0_i32, %c0_i32_0 : i32, i32, i32
  }
}

</mosaic_0001>

<bundles_post_ra>
// kernel: fvae_encoder_forward.3
= control target key start
LH: loop header
LB: loop body
LE: loop exit
PB: predicated region body
PF: predicated region fallthrough
CT: control target
= control target key end

     0   :  { %s422_s15 = smov 0   ;;  %s454_s0 = inlined_call_operand.vmem [shape: f32[2,17,32], index: 0, kind: input, shape index: {}]   ;;  %s455_s1 = inlined_call_operand.vmem [shape: bf16[32,128], index: 1, kind: input, shape index: {}]   ;;  %s456_s2 = inlined_call_operand.vmem [shape: bf16[32,128], index: 2, kind: input, shape index: {}]   ;;  %s457_s3 = inlined_call_operand.vmem [shape: f32[1,128], index: 3, kind: input, shape index: {}]   ;;  %s458_s4 = inlined_call_operand.vmem [shape: f32[2,16,128], index: 4, kind: output, shape index: {}]  }
   0x1 LB: > { %s346_s16 = sadd.s32 4294967295, %s395_s15   ;;  %p350_p0 = scmp.ge.s32.totalorder %s395_s15, 1  ;;  %s395_s15 = sphi %s422_s15, %s14_s15  }
   0x2   : > { %p162_p1 = scmp.lt.s32.totalorder %s395_s15, 3 }
   0x4   : > { %p163_p2 = pnand %p350_p0, %p162_p1 }
   0x5   : > { %p188_p3 = scmp.lt.s32.totalorder (!%p163_p2), %s346_s16, 1 }
   0x6   : > { %166 = sbr.rel (%p163_p2) target bundleno = 164 (0xa4), region = 36 }
   0xb   : > { %v376_v0 = vld [vmem:[%s455_s1 + $0x8] sm:$0xff]  ;;  %v375_v2 = vld [vmem:[%s455_s1] sm:$0xff]  ;;  %s460_s16 = smov (!%p188_p3, %s346_s16), 1  ;;  %vm237_vm0 = vcmask 261120   ;;  %vm212_vm1 = vsmask.f32 7424 }
   0xc   : > { %v378_v1 = vld [vmem:[%s456_s2 + $0x8] sm:$0xff]  ;;  %275 = vmatpush.bf16.msra.mxu1 %v376_v0  ;;  %v377_v3 = vld [vmem:[%s456_s2] sm:$0xff]  ;;  %s379_s25 = smul.u32 24, %s460_s16  ;;  %s374_s29 = sshll.u32 %s460_s16, 4 }
   0xd   : > { %247 = vmatpush.bf16.msra.mxu0 %v378_v1  ;;  %v388_v17 = vld [vmem:[%s457_s3] ss:$0 sm:$0xff]  ;;  %s197_s8 = scalar_lea.vmem %s458_s4, %s374_s29 }
   0xe   : > { %s192_s28 = scalar_lea.vmem %s454_s0, %s379_s25 }
   0xf   : > { %v199_v4 = vld [vmem:[%s192_s28] sm:$0xff]  ;;  %v200_v5 = vld [vmem:[%s192_s28 + $0x8] sm:$0xff]  ;;  %v201_v6 = vld [vmem:[%s192_s28 + $0x10] sm:$0x1] }
  0x10   : > { %276 = vmatpush.bf16.msra.mxu1 %v375_v2  ;;  %v202_v7 = vpack.c.bf16 %v200_v5, %v199_v4  ;;  %v203_v8 = vpack.c.bf16 %v201_v6, %v201_v6 }
  0x11   : > { %248 = vmatpush.bf16.msra.mxu0 %v377_v3 }
  0x12   : > { %v216_v9 = vshll.u32 %v202_v7, 16  ;;  %v214_v10 = vshrl.u32 %v202_v7, 16  ;;  %v221_v11 = vshll.u32 %v203_v8, 16 }
  0x13   : > { %371 = vmatmul.msk.bf16.vlgmr.msra.gmra.mxu1 %vm237_vm0, %v202_v7 }
  0x14   : > { %v218_v12 = vrot.slane %v216_v9, 1  ;;  %v223_v13 = vrot.slane %v221_v11, 1 }
  0x16   : > { %v219_v14 = vor.u32 %v218_v12, %v214_v10 }
  0x18   : > { %v224_v15 = vsel %vm212_vm1, %v219_v14, %v223_v13 }
  0x19   : > { %362 = vmatmul.msk.bf16.vlgmr.msra.gmra.mxu0 %vm237_vm0, %v224_v15 }
  0x90   : > { %v278_v16 = vpop.f32.mrf.mxu1 }
  0x96   : > { %v250_v18 = vpop.f32.mrf.mxu0 }
  0x97   : > { %v279_v19 = vadd.f32 %v278_v16, %v250_v18 }
  0x98   : > { %v280_v21 = vpop.f32.mrf.mxu1 }
  0x99   : > { %v287_v20 = vadd.f32 %v388_v17, %v279_v19 }
  0x9b   : > { %289 = vst [vmem:[%s197_s8] sm:$0xff] %v287_v20 }
  0x9e   : > { %v252_v22 = vpop.f32.mrf.mxu0 }
  0x9f   : > { %v281_v23 = vadd.f32 %v280_v21, %v252_v22 }
  0xa1   : > { %v288_v24 = vadd.f32 %v388_v17, %v281_v23 }
  0xa3   : > { %290 = vst [vmem:[%s197_s8 + $0x8] sm:$0xff] %v288_v24 }
  0xa4 PF: > { %s14_s15 = sadd.s32 1, %s395_s15  }
  0xa5   : > { %p11_p4 = scmp.ge.s32.totalorder %s14_s15, 4  }
  0xa7   :  { %13 = sbr.rel (!%p11_p4) target bundleno = 1 (0x1), region = 66 }

// kernel: fvae_encoder_forward.4
= control target key start
LH: loop header
LB: loop body
LE: loop exit
PB: predicated region body
PF: predicated region fallthrough
CT: control target
= control target key end

     0   :  { %vm39_vm0 = vcmask 130048   ;;  %vm119_vm1 = vcmask 1041408   ;;  %vm122_vm2 = vcmask 519170   ;;  %s219_s3 = inlined_call_operand.vmem [shape: bf16[16,192], index: 3, kind: input, shape index: {}]   ;;  %s220_s2 = inlined_call_operand.vmem [shape: bf16[16,192], index: 2, kind: input, shape index: {}]   ;;  %s221_s1 = inlined_call_operand.vmem [shape: f32[2,16], index: 1, kind: input, shape index: {}]   ;;  %s222_s0 = inlined_call_operand.vmem [shape: f32[2,16], index: 0, kind: input, shape index: {}]   ;;  %s223_s4 = inlined_call_operand.vmem [shape: f32[1,192], index: 4, kind: input, shape index: {}]   ;;  %s224_s5 = inlined_call_operand.vmem [shape: f32[2,192], index: 5, kind: output, shape index: {}]  }
   0x1   :  { %v131_v0 = vld [vmem:[%s219_s3] sm:$0xf]  ;;  %v152_v1 = vld [vmem:[%s219_s3 + $0x4] sm:$0xf0]  ;;  %v151_v2 = vld [vmem:[%s219_s3 + $0x4] sm:$0xf] }
   0x2   :  { %v132_v3 = vor.u32 %v152_v1, %v131_v0  ;;  %v133_v4 = vld [vmem:[%s219_s3 + $0x8] sm:$0xf0]  ;;  %v141_v5 = vld [vmem:[%s220_s2] sm:$0xf]  ;;  %v150_v6 = vld [vmem:[%s220_s2 + $0x4] sm:$0xf0] }
   0x3   :  { %v136_v7 = vor.u32 %v151_v2, %v133_v4  ;;  %v142_v8 = vor.u32 %v150_v6, %v141_v5  ;;  %v149_v9 = vld [vmem:[%s220_s2 + $0x4] sm:$0xf]  ;;  %v143_v10 = vld [vmem:[%s220_s2 + $0x8] sm:$0xf0]  ;;  %v25_v11 = vld [vmem:[%s221_s1] sm:$0x3] }
   0x4   :  { %50 = vmatpush.bf16.msra.mxu0 %v132_v3  ;;  %v146_v12 = vor.u32 %v149_v9, %v143_v10  ;;  %v26_v13 = vpack.c.bf16 %v25_v11, %v25_v11  ;;  %v21_v14 = vld [vmem:[%s222_s0] sm:$0x3]  ;;  %vm123_vm3 = vmor %vm122_vm2, %vm119_vm1 }
   0x5   :  { %63 = vmatpush.bf16.msra.mxu1 %v136_v7  ;;  %89 = vmatpush.bf16.msra.mxu2 %v142_v8  ;;  %v22_v15 = vpack.c.bf16 %v21_v14, %v21_v14  ;;  %v108_v18 = vld [vmem:[%s223_s4] sm:$0x3] }
   0x6   :  { %102 = vmatpush.bf16.msra.mxu3 %v146_v12  ;;  %v111_v20 = vperm.slane %v108_v18, 1  ;;  %v110_v24 = vperm.slane %v108_v18, 0 }
   0x7   :  { %137 = vmatmul.msk.bf16.vlgmr.msra.gmra.mxu0 %vm39_vm0, %v26_v13 }
   0x8   :  { %138 = vmatmul.msk.bf16.vlgmr.msra.gmra.mxu1 %vm39_vm0, %v26_v13  ;;  %147 = vmatmul.msk.bf16.vlgmr.msra.gmra.mxu2 %vm39_vm0, %v22_v15 }
   0x9   :  { %148 = vmatmul.msk.bf16.vlgmr.msra.gmra.mxu3 %vm39_vm0, %v22_v15 }
  0x84   :  { %v52_v16 = vpop.f32.mrf.mxu0 }
  0x85   :  { %v65_v17 = vpop.f32.mrf.mxu1 }
  0x8b   :  { %v91_v19 = vpop.f32.mrf.mxu2 }
  0x8c   :  { %v104_v21 = vpop.f32.mrf.mxu3  ;;  %v54_v22 = vpop.f32.mrf.mxu0  ;;  %v92_v23 = vadd.f32 %v91_v19, %v52_v16 }
  0x8d   :  { %v105_v25 = vadd.f32 %v104_v21, %v65_v17  ;;  %v67_v26 = vpop.f32.mrf.mxu1 }
  0x8e   :  { %v114_v28 = vadd.f32 %v110_v24, %v92_v23 }
  0x8f   :  { %v115_v27 = vadd.f32 %v111_v20, %v105_v25 }
  0x91   :  { %v118_v29 = vrot.slane %v115_v27, 6 }
  0x93   :  { %v120_v30 = vsel %vm119_vm1, %v114_v28, %v118_v29  ;;  %v93_v31 = vpop.f32.mrf.mxu2 }
  0x94   :  { %124 = vst.msk [vmem:[%s224_s5] sm:$0xf] %vm123_vm3, %v120_v30  ;;  %v106_v32 = vpop.f32.mrf.mxu3 }

// kernel: fvae_encoder_forward.5
= control target key start
LH: loop header
LB: loop body
LE: loop exit
PB: predicated region body
PF: predicated region fallthrough
CT: control target
= control target key end

     0   :  { %s3338_s0 = inlined_call_operand.vmem [shape: f32[2,16,128], index: 0, kind: input, shape index: {}]   ;;  %s3339_s1 = inlined_call_operand.vmem [shape: f32[2,16,1], index: 1, kind: input, shape index: {}]   ;;  %s3340_s2 = inlined_call_operand.vmem [shape: f32[2,16,128], index: 2, kind: input, shape index: {}]   ;;  %s3341_s3 = inlined_call_operand.vmem [shape: f32[2,3,1,256], index: 3, kind: input, shape index: {}]   ;;  %s3342_s4 = inlined_call_operand.hbm [shape: bf16[3,5,128,256], index: 4, kind: input, shape index: {}]   ;;  %s3343_s5 = inlined_call_operand.vmem [shape: bf16[3,128,256], index: 5, kind: input, shape index: {}]   ;;  %s3344_s6 = inlined_call_operand.vmem [shape: f32[3,1,256], index: 6, kind: input, shape index: {}]   ;;  %s3345_s7 = inlined_call_operand.vmem [shape: bf16[128,256], index: 7, kind: input, shape index: {}]   ;;  %s3346_s8 = inlined_call_operand.vmem [shape: f32[1,256], index: 8, kind: input, shape index: {}]   ;;  %s3347_s9 = inlined_call_operand.vmem [shape: f32[2,16,128], index: 9, kind: output, shape index: {0}]   ;;  %s3348_s10 = inlined_call_operand.vmem [shape: f32[2,16,128], index: 10, kind: output, shape index: {1}]   ;;  %s3349_s11 = inlined_call_operand.vmem [shape: f32[2,16,128], index: 11, kind: output, shape index: {2}]  }
   0x1   :  { %3354 = sst [smem:[#allocation13_spill]] %s3338_s0 }
   0x2   :  { %3355 = sst [smem:[#allocation14_spill]] %s3339_s1 }
   0x3   :  { %3356 = sst [smem:[#allocation15_spill]] %s3340_s2 }
   0x4   :  { %3357 = sst [smem:[#allocation16_spill]] %s3342_s4 }
   0x5   :  { %3358 = sst [smem:[#allocation17_spill]] %s3346_s8 }
   0x6   :  { %17 = vsyncpa [#allocation5], 0 }
   0x7   :  { %19 = vsyncpa [#allocation5 + $0x1], 0  ;;  %s2798_s17 = smov 0   ;;  %s2800_s18 = smov 0  }
   0x8   :  { %s2802_s19 = smov 0   ;;  %s2804_s20 = smov 0  }
   0x9   :  { %s2806_s21 = smov 0   ;;  %s2808_s22 = smov 0  }
   0xa   :  { %s2810_s23 = smov 0   ;;  %s2812_s24 = smov 0  }
   0xb LB: > { %3359 = sst [smem:[#allocation7_spill]] %s2710_s19  ;;  %s1868_s25 = sadd.s32 4294967295, %s2730_s24   ;;  %s2730_s24 = sphi %s2812_s24, %s25_s24   ;;  %s2726_s23 = sphi %s2810_s23, %s3381_s23   ;;  %s2722_s22 = sphi %s2808_s22, %s3380_s22   ;;  %s2718_s21 = sphi %s2806_s21, %s3379_s21   ;;  %s2714_s20 = sphi %s2804_s20, %s3378_s20   ;;  %s2710_s19 = sphi %s2802_s19, %s3377_s19   ;;  %s2706_s18 = sphi %s2800_s18, %s3383_s18   ;;  %s2702_s17 = sphi %s2798_s17, %s3382_s17  }
   0xc   : > { %3360 = sst [smem:[#allocation8_spill]] %s2722_s22  ;;  %s34_s26 = sadd.s32 1, %s2722_s22 }
   0xd   : > { %3361 = sst [smem:[#allocation9_spill]] %s2726_s23  ;;  %p35_p0 = scmp.ge.s32.totalorder %s34_s26, 3 }
   0xe   : > { %s37_s27 = sadd.s32 1, %s2726_s23  ;;  %s150_s28 = sadd.s32 1, %s2710_s19 }
   0xf   : > { %p157_p1 = scmp.ne.s32.totalorder %s2710_s19, %s2706_s18  ;;  %s3385_s26 = smov (%p35_p0, %s34_s26), 0 }
  0x10   : > { %3362 = sst [smem:[#allocation10_spill]] %s3385_s26  ;;  %s3387_s27 = smov (!%p35_p0, %s37_s27), %s2726_s23 }
  0x11   : > { %s147_s29 = ssub.s32 %s2722_s22, %s3385_s26  ;;  %p158_p2 = scmp.eq.s32.totalorder %s2730_s24, 0 }
  0x12   : > { %p39_p3 = scmp.ge.s32.totalorder %s3387_s27, 2  ;;  %p148_p4 = scmp.eq.s32.totalorder %s147_s29, 0 }
  0x13   : > { %p159_p5 = por %p158_p2, %p157_p1  ;;  %p163_p6 = scmp.ne.s32.totalorder %s2706_s18, %s2702_s17 }
  0x14   : > { %s3389_s27 = smov (%p39_p3, %s3387_s27), 0  ;;  %p164_p7 = scmp.eq.s32.totalorder %s1868_s25, 0 }
  0x15   : > { %3363 = sst [smem:[#allocation11_spill]] %s3389_s27  ;;  %p2545_p8 = scmp.lt.s32.totalorder %s2730_s24, 6 }
  0x16   : > { %s2852_s30 = scalar_select %p148_p4, %s2710_s19, %s150_s28  }
  0x17   : > { %s400_s12 = sand.u32 1, %s2710_s19   ;;  %p2856_p9 = por %p164_p7, %p163_p6 }
  0x18   : > { %3364 = sst [smem:[#allocation12_spill]] %s2852_s30  ;;  %s2535_s14 = smul.u32 640, %s400_s12 }
  0x19   : > { %p2542_p10 = pnand %p2545_p8, %p159_p5  ;;  %s2536_s15 = smul.u32 640, %s2722_s22 }
  0x1a   : > { %s3366_s4 = sld [smem:[#allocation16_spill]]  ;;  %s404_s26 = scalar_lea.vmem [#allocation4], %s2535_s14 }
  0x1b   : > { %s412_s27 = sshll.u32 %s404_s26, 4  ;;  %s401_s25 = scalar_lea.sflag [#allocation5], %s400_s12  ;;  %s413_s27 = int_to_ptr.vmem [resolvable:$true] %s412_s27 }
  0x1c   : > { %s2732_s23 = smov 128   ;;  %s2733_s30 = smov 8  }
  0x1d   : > { %p1873_p11 = scmp.ge.s32.totalorder %s2730_s24, 1  ;;  %p435_p12 = scmp.lt.s32.totalorder %s2730_s24, 7 }
  0x1f   : > { %p436_p13 = pnand %p1873_p11, %p435_p12 }
  0x20   : > { %s409_s17 = scalar_lea.hbm %s3366_s4, %s2536_s15  ;;  %s441_s22 = sand.u32 (!%p436_p13), 1, %s2706_s18  }
  0x21   : > { %s410_s28 = sshll.u32 %s409_s17, 4  ;;  %439 = sbr.rel (%p436_p13) target bundleno = 782 (0x30e), region = 56  ;;  %s411_s28 = int_to_ptr.hbm [resolvable:$true] %s410_s28 }
  0x22   : > { %2544 = dma.hbm_to_vmem [thread:$0]  (!%p2542_p10), %s411_s28, 10240, %s413_s27, %s401_s25, %s2732_s23, %s2732_s23, %s2733_s30  }
  0x23   : > { %s2537_s19 = smul.u32 (!%p436_p13), 640, %s441_s22  ;;  %s442_s8 = scalar_lea.sflag (!%p436_p13), [#allocation5], %s441_s22 }
  0x25   : > { %s2867_s16 = scalar_lea.vmem (!%p436_p13), [#allocation4], %s2537_s19 }
  0x26   : > { %2697 = dma.done.wait (%p2856_p9), %s442_s8, 10240  }
  0x27   : > { %2699 = vsyncadd (%p2856_p9), %s442_s8, 4294957056  ;;  %p527_p0 = scmp.lt.s32.totalorder %s2718_s21, 1  ;;  %p544_p1 = scmp.lt.s32.totalorder %s2714_s20, 2 }
  0x28   : > { %s3367_s0 = sld [smem:[#allocation13_spill]]  ;;  %p1890_p2 = scmp.ne.s32.totalorder %s2714_s20, 0 }
  0x29   : > { %s3391_s21 = smov (!%p527_p0, %s2718_s21), 1  ;;  %s3368_s1 = sld [smem:[#allocation14_spill]] }
  0x2a   : > { %s545_s23 = scalar_select %p544_p1, %s2714_s20, 2 }
  0x2b   : > { %s2416_s26 = sshll.u32 %s3391_s21, 4  ;;  %s2538_s27 = smul.u32 6, %s3391_s21 }
  0x2c   : > { %s3369_s2 = sld [smem:[#allocation15_spill]]  ;;  %s1880_s17 = sshll.u32 %s545_s23, 1 }
  0x2d   : > { %s2888_s28 = sadd.s32 %s2538_s27, %s1880_s17  ;;  %s2419_s25 = sshll.u32 %s545_s23, 7 }
  0x2e   : > { %s531_s19 = scalar_lea.vmem %s3367_s0, %s2416_s26  ;;  %s2901_s0 = scalar_lea.vmem %s3343_s5, %s2419_s25 }
  0x2f   : > { %s536_s15 = scalar_lea.vmem %s3368_s1, %s2416_s26  ;;  %s2906_s27 = scalar_lea.vmem %s3344_s6, %s1880_s17 }
  0x30   : > { %v2890_v0 = vld [vmem:[%s536_s15] sm:$0xff]  ;;  %v2892_v1 = vld [vmem:[%s536_s15 + $0x8] sm:$0xff]  ;;  %s2916_s21 = scalar_lea.vmem %s3348_s10, %s2416_s26  ;;  %s2921_s25 = scalar_lea.vmem %s3349_s11, %s2416_s26 }
  0x31   : > { %579 = sbr.rel (%p1890_p2) target bundleno = 182 (0xb6), region = 64 }
  0x32   : > { %s2886_s29 = scalar_lea.vmem %s3369_s2, %s2416_s26  ;;  %s2911_s2 = scalar_lea.vmem %s3347_s9, %s2416_s26 }
  0x36   : > { %v2734_v2 = vmov 0   ;;  %v2735_v3 = vmov 0.0   ;;  %v580_v4 = vld [vmem:[%s531_s19] sm:$0xff]  ;;  %v581_v7 = vld [vmem:[%s531_s19 + $0x8] sm:$0xff] }
  0x37   : > { %2616 = vset.pattern.permute.xlu0 %v2734_v2  ;;  %596 = vst [vmem:[#allocation3 + $0x8] sm:$0xff] %v2735_v3 }
  0x38   : > { %584 = vperm.xlu0 %2616, %v2890_v0   ;;  %597 = vst [vmem:[#allocation3] sm:$0xff] %v2735_v3 }
  0x40   : > { %589 = vperm.xlu0 %2616, %v2892_v1  }
  0xaa   : > { %v585_v5 = vpop.permute.xlu0 %584 }
  0xab   : > { %v592_v6 = vmul.f32 %v585_v5, %v580_v4 }
  0xad   : > { %594 = vst [vmem:[#allocation2] sm:$0xff] %v592_v6 }
  0xb2   : > { %v590_v8 = vpop.permute.xlu0 %589 }
  0xb3   : > { %v593_v9 = vmul.f32 %v590_v8, %v581_v7 }
  0xb5   : > { %595 = vst [vmem:[#allocation2 + $0x8] sm:$0xff] %v593_v9 }
  0xb6 PF: > { %v1965_v10 = vld [vmem:[%s2867_s16 + $0xf0] sm:$0xf]  ;;  %v2454_v11 = vld [vmem:[%s2867_s16 + $0xf4] sm:$0xf0]  ;;  %v2453_v12 = vld [vmem:[%s2867_s16 + $0xf4] sm:$0xf] }
  0xb7   : > { %v1966_v13 = vor.u32 %v2454_v11, %v1965_v10  ;;  %v1967_v14 = vld [vmem:[%s2867_s16 + $0xf8] sm:$0xf0]  ;;  %v2437_v15 = vld [vmem:[%s2867_s16 + $0x74] sm:$0xf]  ;;  %v1957_v19 = vld [vmem:[%s2867_s16 + $0xe0] sm:$0xf] }
  0xb8   : > { %v2031_v16 = vld [vmem:[%s2867_s16 + $0x78] sm:$0xf0]  ;;  %v1970_v17 = vor.u32 %v2453_v12, %v1967_v14  ;;  %v2452_v20 = vld [vmem:[%s2867_s16 + $0xe4] sm:$0xf0]  ;;  %v2451_v21 = vld [vmem:[%s2867_s16 + $0xe4] sm:$0xf] }
  0xb9   : > { %v2034_v18 = vor.u32 %v2437_v15, %v2031_v16  ;;  %740 = vmatpush.bf16.msra.mxu0 %v1966_v13  ;;  %v1958_v22 = vor.u32 %v2452_v20, %v1957_v19  ;;  %v1959_v23 = vld [vmem:[%s2867_s16 + $0xe8] sm:$0xf0]  ;;  %v2435_v24 = vld [vmem:[%s2867_s16 + $0x64] sm:$0xf]  ;;  %v1949_v28 = vld [vmem:[%s2867_s16 + $0xd0] sm:$0xf] }
  0xba   : > { %v2023_v25 = vld [vmem:[%s2867_s16 + $0x68] sm:$0xf0]  ;;  %754 = vmatpush.bf16.msra.mxu1 %v1970_v17  ;;  %v1962_v26 = vor.u32 %v2451_v21, %v1959_v23  ;;  %v2450_v29 = vld [vmem:[%s2867_s16 + $0xd4] sm:$0xf0]  ;;  %v2449_v30 = vld [vmem:[%s2867_s16 + $0xd4] sm:$0xf] }
  0xbb   : > { %862 = vmatpush.bf16.msra.mxu3 %v2034_v18  ;;  %v2026_v27 = vor.u32 %v2435_v24, %v2023_v25  ;;  %v1951_v31 = vld [vmem:[%s2867_s16 + $0xd8] sm:$0xf0]  ;;  %v2029_v32 = vld [vmem:[%s2867_s16 + $0x70] sm:$0xf]  ;;  %v2438_v33 = vld [vmem:[%s2867_s16 + $0x74] sm:$0xf0]  ;;  %v1950_v37 = vor.u32 %v2450_v29, %v1949_v28 }
  0xbc   : > { %v2030_v34 = vor.u32 %v2438_v33, %v2029_v32  ;;  %v2433_v35 = vld [vmem:[%s2867_s16 + $0x54] sm:$0xf]  ;;  %v2015_v36 = vld [vmem:[%s2867_s16 + $0x58] sm:$0xf0]  ;;  %v1941_v38 = vld [vmem:[%s2867_s16 + $0xc0] sm:$0xf]  ;;  %v1954_v40 = vor.u32 %v2449_v30, %v1951_v31 }
  0xbd   : > { %741 = vmatpush.bf16.msra.mxu0 %v1958_v22  ;;  %v2448_v39 = vld [vmem:[%s2867_s16 + $0xc4] sm:$0xf0]  ;;  %v2018_v41 = vor.u32 %v2433_v35, %v2015_v36  ;;  %v2447_v42 = vld [vmem:[%s2867_s16 + $0xc4] sm:$0xf]  ;;  %v2021_v43 = vld [vmem:[%s2867_s16 + $0x60] sm:$0xf] }
  0xbe   : > { %755 = vmatpush.bf16.msra.mxu1 %v1962_v26  ;;  %v2436_v44 = vld [vmem:[%s2867_s16 + $0x64] sm:$0xf0]  ;;  %848 = vmatpush.bf16.msra.mxu2 %v2030_v34  ;;  %v1943_v45 = vld [vmem:[%s2867_s16 + $0xc8] sm:$0xf0]  ;;  %v2431_v47 = vld [vmem:[%s2867_s16 + $0x44] sm:$0xf]  ;;  %v1942_v50 = vor.u32 %v2448_v39, %v1941_v38 }
  0xbf   : > { %863 = vmatpush.bf16.msra.mxu3 %v2026_v27  ;;  %v2022_v46 = vor.u32 %v2436_v44, %v2021_v43  ;;  %v2007_v48 = vld [vmem:[%s2867_s16 + $0x48] sm:$0xf0]  ;;  %v2013_v49 = vld [vmem:[%s2867_s16 + $0x50] sm:$0xf]  ;;  %v2434_v51 = vld [vmem:[%s2867_s16 + $0x54] sm:$0xf0]  ;;  %v1946_v52 = vor.u32 %v2447_v42, %v1943_v45 }
  0xc0   : > { %v2010_v53 = vor.u32 %v2431_v47, %v2007_v48  ;;  %v1933_v54 = vld [vmem:[%s2867_s16 + $0xb0] sm:$0xf]  ;;  %v2446_v55 = vld [vmem:[%s2867_s16 + $0xb4] sm:$0xf0]  ;;  %v2445_v56 = vld [vmem:[%s2867_s16 + $0xb4] sm:$0xf]  ;;  %v2014_v58 = vor.u32 %v2434_v51, %v2013_v49 }
  0xc1   : > { %742 = vmatpush.bf16.msra.mxu0 %v1950_v37  ;;  %v1935_v57 = vld [vmem:[%s2867_s16 + $0xb8] sm:$0xf0]  ;;  %v2429_v59 = vld [vmem:[%s2867_s16 + $0x34] sm:$0xf]  ;;  %v2005_v61 = vld [vmem:[%s2867_s16 + $0x40] sm:$0xf]  ;;  %v1934_v63 = vor.u32 %v2446_v55, %v1933_v54 }
  0xc2   : > { %756 = vmatpush.bf16.msra.mxu1 %v1954_v40  ;;  %849 = vmatpush.bf16.msra.mxu2 %v2022_v46  ;;  %v1999_v60 = vld [vmem:[%s2867_s16 + $0x38] sm:$0xf0]  ;;  %v2432_v62 = vld [vmem:[%s2867_s16 + $0x44] sm:$0xf0]  ;;  %v1938_v2 = vor.u32 %v2445_v56, %v1935_v57  ;;  %v1925_v4 = vld [vmem:[%s2867_s16 + $0xa0] sm:$0xf] }
  0xc3   : > { %864 = vmatpush.bf16.msra.mxu3 %v2018_v41  ;;  %v2002_v3 = vor.u32 %v2429_v59, %v1999_v60  ;;  %v2444_v5 = vld [vmem:[%s2867_s16 + $0xa4] sm:$0xf0]  ;;  %v2443_v6 = vld [vmem:[%s2867_s16 + $0xa4] sm:$0xf]  ;;  %v1927_v7 = vld [vmem:[%s2867_s16 + $0xa8] sm:$0xf0]  ;;  %v2006_v8 = vor.u32 %v2432_v62, %v2005_v61 }
  0xc4   : > { %v2427_v9 = vld [vmem:[%s2867_s16 + $0x24] sm:$0xf]  ;;  %v1991_v10 = vld [vmem:[%s2867_s16 + $0x28] sm:$0xf0]  ;;  %v1997_v11 = vld [vmem:[%s2867_s16 + $0x30] sm:$0xf]  ;;  %v1926_v13 = vor.u32 %v2444_v5, %v1925_v4  ;;  %v1930_v14 = vor.u32 %v2443_v6, %v1927_v7 }
  0xc5   : > { %743 = vmatpush.bf16.msra.mxu0 %v1942_v50  ;;  %v2430_v12 = vld [vmem:[%s2867_s16 + $0x34] sm:$0xf0]  ;;  %v1994_v15 = vor.u32 %v2427_v9, %v1991_v10  ;;  %v1917_v16 = vld [vmem:[%s2867_s16 + $0x90] sm:$0xf]  ;;  %v2441_v18 = vld [vmem:[%s2867_s16 + $0x94] sm:$0xf] }
  0xc6   : > { %757 = vmatpush.bf16.msra.mxu1 %v1946_v52  ;;  %850 = vmatpush.bf16.msra.mxu2 %v2014_v58  ;;  %v2442_v17 = vld [vmem:[%s2867_s16 + $0x94] sm:$0xf0]  ;;  %v1919_v19 = vld [vmem:[%s2867_s16 + $0x98] sm:$0xf0]  ;;  %v1998_v20 = vor.u32 %v2430_v12, %v1997_v11  ;;  %v2425_v21 = vld [vmem:[%s2867_s16 + $0x14] sm:$0xf] }
  0xc7   : > { %865 = vmatpush.bf16.msra.mxu3 %v2010_v53  ;;  %v1983_v22 = vld [vmem:[%s2867_s16 + $0x18] sm:$0xf0]  ;;  %v1989_v23 = vld [vmem:[%s2867_s16 + $0x20] sm:$0xf]  ;;  %v2428_v24 = vld [vmem:[%s2867_s16 + $0x24] sm:$0xf0]  ;;  %v1918_v25 = vor.u32 %v2442_v17, %v1917_v16  ;;  %v1922_v28 = vor.u32 %v2441_v18, %v1919_v19 }
  0xc8   : > { %v1909_v26 = vld [vmem:[%s2867_s16 + $0x80] sm:$0xf]  ;;  %v2440_v27 = vld [vmem:[%s2867_s16 + $0x84] sm:$0xf0]  ;;  %v1986_v29 = vor.u32 %v2425_v21, %v1983_v22  ;;  %v2439_v30 = vld [vmem:[%s2867_s16 + $0x84] sm:$0xf]  ;;  %v1990_v33 = vor.u32 %v2428_v24, %v1989_v23 }
  0xc9   : > { %744 = vmatpush.bf16.msra.mxu0 %v1934_v63  ;;  %v1911_v31 = vld [vmem:[%s2867_s16 + $0x88] sm:$0xf0]  ;;  %v2423_v32 = vld [vmem:[%s2867_s16 + $0x4] sm:$0xf]  ;;  %v2117_v35 = vld [vmem:[%s2867_s16 + $0x170] sm:$0xf]  ;;  %v1910_v40 = vor.u32 %v2440_v27, %v1909_v26 }
  0xca   : > { %758 = vmatpush.bf16.msra.mxu1 %v1938_v2  ;;  %851 = vmatpush.bf16.msra.mxu2 %v2006_v8  ;;  %v1975_v34 = vld [vmem:[%s2867_s16 + $0x8] sm:$0xf0]  ;;  %v2470_v36 = vld [vmem:[%s2867_s16 + $0x174] sm:$0xf0]  ;;  %v2469_v37 = vld [vmem:[%s2867_s16 + $0x174] sm:$0xf]  ;;  %v1914_v44 = vor.u32 %v2439_v30, %v1911_v31 }
  0xcb   : > { %866 = vmatpush.bf16.msra.mxu3 %v2002_v3  ;;  %v2119_v38 = vld [vmem:[%s2867_s16 + $0x178] sm:$0xf0]  ;;  %v2485_v39 = vld [vmem:[%s2867_s16 + $0x1f4] sm:$0xf]  ;;  %v1981_v42 = vld [vmem:[%s2867_s16 + $0x10] sm:$0xf]  ;;  %v1978_v45 = vor.u32 %v2423_v32, %v1975_v34  ;;  %v2118_v47 = vor.u32 %v2470_v36, %v2117_v35 }
  0xcc   : > { %v2199_v41 = vld [vmem:[%s2867_s16 + $0x1f8] sm:$0xf0]  ;;  %v2426_v43 = vld [vmem:[%s2867_s16 + $0x14] sm:$0xf0]  ;;  %v2109_v46 = vld [vmem:[%s2867_s16 + $0x160] sm:$0xf]  ;;  %v2122_v48 = vor.u32 %v2469_v37, %v2119_v38 }
  0xcd   : > { %745 = vmatpush.bf16.msra.mxu0 %v1926_v13  ;;  %v2468_v49 = vld [vmem:[%s2867_s16 + $0x164] sm:$0xf0]  ;;  %v2467_v50 = vld [vmem:[%s2867_s16 + $0x164] sm:$0xf]  ;;  %v2111_v51 = vld [vmem:[%s2867_s16 + $0x168] sm:$0xf0]  ;;  %v2202_v52 = vor.u32 %v2485_v39, %v2199_v41  ;;  %v1982_v53 = vor.u32 %v2426_v43, %v1981_v42 }
  0xce   : > { %759 = vmatpush.bf16.msra.mxu1 %v1930_v14  ;;  %852 = vmatpush.bf16.msra.mxu2 %v1998_v20  ;;  %v2483_v54 = vld [vmem:[%s2867_s16 + $0x1e4] sm:$0xf]  ;;  %v2191_v55 = vld [vmem:[%s2867_s16 + $0x1e8] sm:$0xf0]  ;;  %vm602_vm0 = vcmask 1041408   ;;  %v2110_v2 = vor.u32 %v2468_v49, %v2109_v46  ;;  %v2114_v3 = vor.u32 %v2467_v50, %v2111_v51  ;;  %vm2736_vm2 = vmmov 1  }
  0xcf   : > { %867 = vmatpush.bf16.msra.mxu3 %v1994_v15  ;;  %v3000_v56 = vld [vmem:[#allocation2] sm:$0xff]  ;;  %v2424_v58 = vld [vmem:[%s2867_s16 + $0x4] sm:$0xf0]  ;;  %v2197_v61 = vld [vmem:[%s2867_s16 + $0x1f0] sm:$0xf]  ;;  %v2194_v8 = vor.u32 %v2483_v54, %v2191_v55  ;;  %vm895_vm5 = vcmask 1046528  }
  0xd0   : > { %v1973_v57 = vld [vmem:[%s2867_s16] sm:$0xf]  ;;  %v3004_v59 = vld [vmem:[#allocation2 + $0x8] sm:$0xff]  ;;  %v603_v60 = vrot.slane %v3000_v56, 6  ;;  %v2486_v62 = vld [vmem:[%s2867_s16 + $0x1f4] sm:$0xf0] }
  0xd1   : > { %746 = vmatpush.bf16.msra.mxu0 %v1918_v25  ;;  %v604_v63 = vrot.slane %v3004_v59, 6  ;;  %v2101_v4 = vld [vmem:[%s2867_s16 + $0x150] sm:$0xf]  ;;  %v2466_v5 = vld [vmem:[%s2867_s16 + $0x154] sm:$0xf0]  ;;  %vm3014_vm1 = vmneg %vm602_vm0  ;;  %v1974_v9 = vor.u32 %v2424_v58, %v1973_v57  ;;  %v2198_v14 = vor.u32 %v2486_v62, %v2197_v61  ;;  %vm1169_vm7 = vcmask 1045504  }
  0xd2   : > { %760 = vmatpush.bf16.msra.mxu1 %v1922_v28  ;;  %853 = vmatpush.bf16.msra.mxu2 %v1990_v33  ;;  %v609_v6 = vsel %vm602_vm0, 0.0, %v603_v60  ;;  %v2465_v10 = vld [vmem:[%s2867_s16 + $0x154] sm:$0xf]  ;;  %v2103_v11 = vld [vmem:[%s2867_s16 + $0x158] sm:$0xf0]  ;;  %v2102_v20 = vor.u32 %v2466_v5, %v2101_v4  ;;  %vm3032_vm3 = vmpackc.low %vm2736_vm2, %vm3014_vm1  ;;  %p2349_p3 = scmp.ne.s32.totalorder %s2714_s20, 2 }
  0xd3   : > { %868 = vmatpush.bf16.msra.mxu3 %v1986_v29  ;;  %v605_v12 = vsel %vm602_vm0, %v603_v60, %v604_v63  ;;  %v610_v13 = vsel %vm602_vm0, %v604_v63, 0.0  ;;  %v2481_v15 = vld [vmem:[%s2867_s16 + $0x1d4] sm:$0xf]  ;;  %v2183_v16 = vld [vmem:[%s2867_s16 + $0x1d8] sm:$0xf0]  ;;  %v2106_v24 = vor.u32 %v2465_v10, %v2103_v11  ;;  %s3375_s23 = sld [smem:[#allocation17_spill]] (!%p2349_p3) }
  0xd4   : > { %v3024_v17 = vpack.c.bf16 %v605_v12, %v609_v6  ;;  %v3026_v18 = vpack.c.bf16 %v610_v13, %v610_v13  ;;  %v2037_v19 = vpack.c.bf16 %v605_v12, %v603_v60  ;;  %v2189_v21 = vld [vmem:[%s2867_s16 + $0x1e0] sm:$0xf]  ;;  %v2484_v22 = vld [vmem:[%s2867_s16 + $0x1e4] sm:$0xf0]  ;;  %v2186_v29 = vor.u32 %v2481_v15, %v2183_v16  ;;  %v2463_v31 = vld [vmem:[%s2867_s16 + $0x144] sm:$0xf] }
  0xd5   : > { %747 = vmatpush.bf16.msra.mxu0 %v1910_v40  ;;  %v2093_v25 = vld [vmem:[%s2867_s16 + $0x140] sm:$0xf]  ;;  %v2464_v30 = vld [vmem:[%s2867_s16 + $0x144] sm:$0xf0]  ;;  %v2095_v32 = vld [vmem:[%s2867_s16 + $0x148] sm:$0xf0]  ;;  %v2190_v33 = vor.u32 %v2484_v22, %v2189_v21 }
  0xd6   : > { %761 = vmatpush.bf16.msra.mxu1 %v1914_v44  ;;  %854 = vmatpush.bf16.msra.mxu2 %v1982_v53  ;;  %v648_v26 = vshrl.u32 %v3024_v17, 16  ;;  %v650_v27 = vshll.u32 %v3024_v17, 16  ;;  %v655_v28 = vshll.u32 %v3026_v18, 16  ;;  %v2479_v34 = vld [vmem:[%s2867_s16 + $0x1c4] sm:$0xf]  ;;  %v2094_v40 = vor.u32 %v2464_v30, %v2093_v25 }
  0xd7   : > { %869 = vmatpush.bf16.msra.mxu3 %v1978_v45  ;;  %v2175_v35 = vld [vmem:[%s2867_s16 + $0x1c8] sm:$0xf0]  ;;  %vm646_vm4 = vsmask.f32 7424  ;;  %v2181_v38 = vld [vmem:[%s2867_s16 + $0x1d0] sm:$0xf]  ;;  %v2098_v41 = vor.u32 %v2463_v31, %v2095_v32 }
  0xd8   : > { %v652_v36 = vrot.slane %v650_v27, 1  ;;  %v657_v37 = vrot.slane %v655_v28, 1  ;;  %v2482_v39 = vld [vmem:[%s2867_s16 + $0x1d4] sm:$0xf0]  ;;  %v2085_v43 = vld [vmem:[%s2867_s16 + $0x130] sm:$0xf]  ;;  %v2178_v44 = vor.u32 %v2479_v34, %v2175_v35 }
  0xd9   : > { %980 = vmatpush.bf16.msrb.mxu0 %v2118_v47  ;;  %v2462_v45 = vld [vmem:[%s2867_s16 + $0x134] sm:$0xf0]  ;;  %v2461_v46 = vld [vmem:[%s2867_s16 + $0x134] sm:$0xf]  ;;  %v2087_v47 = vld [vmem:[%s2867_s16 + $0x138] sm:$0xf0]  ;;  %v2182_v49 = vor.u32 %v2482_v39, %v2181_v38 }
  0xda   : > { %994 = vmatpush.bf16.msrb.mxu1 %v2122_v48  ;;  %855 = vmatpush.bf16.msra.mxu2 %v1974_v9  ;;  %v653_v42 = vor.u32 %v652_v36, %v648_v26  ;;  %v2477_v50 = vld [vmem:[%s2867_s16 + $0x1b4] sm:$0xf]  ;;  %v2167_v51 = vld [vmem:[%s2867_s16 + $0x1b8] sm:$0xf0]  ;;  %v2480_v53 = vld [vmem:[%s2867_s16 + $0x1c4] sm:$0xf0]  ;;  %v2086_v54 = vor.u32 %v2462_v45, %v2085_v43  ;;  %v2090_v55 = vor.u32 %v2461_v46, %v2087_v47 }
  0xdb   : > { %1134 = vmatpush.bf16.msrb.mxu3 %v2202_v52  ;;  %v2173_v52 = vld [vmem:[%s2867_s16 + $0x1c0] sm:$0xf]  ;;  %v2170_v58 = vor.u32 %v2477_v50, %v2167_v51  ;;  %v2460_v60 = vld [vmem:[%s2867_s16 + $0x124] sm:$0xf0]  ;;  %v2459_v61 = vld [vmem:[%s2867_s16 + $0x124] sm:$0xf] }
  0xdc   : > { %2042 = vmatmul.msk.bf16.vlgmr.msra.gmra.mxu3 %vm3032_vm3, %v2037_v19  ;;  %v658_v48 = vsel %vm646_vm4, %v653_v42, %v657_v37  ;;  %v2077_v57 = vld [vmem:[%s2867_s16 + $0x120] sm:$0xf]  ;;  %v2079_v62 = vld [vmem:[%s2867_s16 + $0x128] sm:$0xf0]  ;;  %v2174_v63 = vor.u32 %v2480_v53, %v2173_v52  ;;  %v2069_v4 = vld [vmem:[%s2867_s16 + $0x110] sm:$0xf] }
  0xdd   : > { %981 = vmatpush.bf16.msrb.mxu0 %v2110_v2  ;;  %2038 = vmatmul.msk.bf16.vlgmr.msra.gmra.mxu2 %vm3032_vm3, %v2037_v19  ;;  %v2475_v2 = vld [vmem:[%s2867_s16 + $0x1a4] sm:$0xf]  ;;  %v2165_v5 = vld [vmem:[%s2867_s16 + $0x1b0] sm:$0xf]  ;;  %v2478_v6 = vld [vmem:[%s2867_s16 + $0x1b4] sm:$0xf0]  ;;  %v2078_v7 = vor.u32 %v2460_v60, %v2077_v57 }
  0xde   : > { %995 = vmatpush.bf16.msrb.mxu1 %v2114_v3  ;;  %1120 = vmatpush.bf16.msrb.mxu2 %v2198_v14  ;;  %v2159_v3 = vld [vmem:[%s2867_s16 + $0x1a8] sm:$0xf0]  ;;  %v2458_v9 = vld [vmem:[%s2867_s16 + $0x114] sm:$0xf0]  ;;  %v2457_v10 = vld [vmem:[%s2867_s16 + $0x114] sm:$0xf]  ;;  %v2166_v16 = vor.u32 %v2478_v6, %v2165_v5 }
  0xdf   : > { %1135 = vmatpush.bf16.msrb.mxu3 %v2194_v8  ;;  %762 = vmatmul.bf16.vlgmr.msra.gmra.mxu1 %v658_v48  ;;  %v2082_v8 = vor.u32 %v2459_v61, %v2079_v62  ;;  %v2071_v11 = vld [vmem:[%s2867_s16 + $0x118] sm:$0xf0]  ;;  %v2162_v12 = vor.u32 %v2475_v2, %v2159_v3  ;;  %v2473_v13 = vld [vmem:[%s2867_s16 + $0x194] sm:$0xf]  ;;  %v1033_v15 = vshrl.u32 %v3026_v18, 16  ;;  %v2070_v23 = vor.u32 %v2458_v9, %v2069_v4 }
  0xe0   : > { %748 = vmatmul.bf16.vlgmr.msra.gmra.mxu0 %v658_v48  ;;  %v2151_v14 = vld [vmem:[%s2867_s16 + $0x198] sm:$0xf0]  ;;  %v2061_v19 = vld [vmem:[%s2867_s16 + $0x100] sm:$0xf]  ;;  %v2476_v22 = vld [vmem:[%s2867_s16 + $0x1a4] sm:$0xf0] }
  0xe1   : > { %982 = vmatpush.bf16.msrb.mxu0 %v2102_v20  ;;  %v2456_v20 = vld [vmem:[%s2867_s16 + $0x104] sm:$0xf0]  ;;  %v2157_v21 = vld [vmem:[%s2867_s16 + $0x1a0] sm:$0xf]  ;;  %v2154_v25 = vor.u32 %v2473_v13, %v2151_v14  ;;  %v2063_v30 = vld [vmem:[%s2867_s16 + $0x108] sm:$0xf0] }
  0xe2   : > { %996 = vmatpush.bf16.msrb.mxu1 %v2106_v24  ;;  %1121 = vmatpush.bf16.msrb.mxu2 %v2190_v33  ;;  %v2074_v24 = vor.u32 %v2457_v10, %v2071_v11  ;;  %v2471_v31 = vld [vmem:[%s2867_s16 + $0x184] sm:$0xf]  ;;  %v2143_v32 = vld [vmem:[%s2867_s16 + $0x188] sm:$0xf0]  ;;  %v1030_v33 = vrot.slane %v648_v26, 1  ;;  %v1031_v34 = vrot.slane %v650_v27, 2  ;;  %v2158_v37 = vor.u32 %v2476_v22, %v2157_v21 }
  0xe3   : > { %1136 = vmatpush.bf16.msrb.mxu3 %v2186_v29  ;;  %v2455_v29 = vld [vmem:[%s2867_s16 + $0x104] sm:$0xf]  ;;  %v1035_v35 = vrot.slane %v1033_v15, 1  ;;  %v1036_v36 = vrot.slane %v655_v28, 2  ;;  %v2277_v38 = vld [vmem:[%s2867_s16 + $0x270] sm:$0xf]  ;;  %v2146_v27 = vor.u32 %v2471_v31, %v2143_v32 }
  0xe4   : > { %v2502_v39 = vld [vmem:[%s2867_s16 + $0x274] sm:$0xf0]  ;;  %v2279_v42 = vld [vmem:[%s2867_s16 + $0x278] sm:$0xf0]  ;;  %v2149_v43 = vld [vmem:[%s2867_s16 + $0x190] sm:$0xf]  ;;  %v2066_v26 = vor.u32 %v2455_v29, %v2063_v30  ;;  %v1032_v47 = vor.u32 %v1031_v34, %v1030_v33 }
  0xe5   : > { %983 = vmatpush.bf16.msrb.mxu0 %v2094_v40  ;;  %v2501_v40 = vld [vmem:[%s2867_s16 + $0x274] sm:$0xf]  ;;  %v896_v28 = vrot.slane %v3024_v17, 1  ;;  %v897_v45 = vrot.slane %v3026_v18, 1  ;;  %v2278_v46 = vor.u32 %v2502_v39, %v2277_v38  ;;  %vm1029_vm6 = vsmask.f32 6400 }
  0xe6   : > { %997 = vmatpush.bf16.msrb.mxu1 %v2098_v41  ;;  %1122 = vmatpush.bf16.msrb.mxu2 %v2182_v49  ;;  %v2062_v41 = vor.u32 %v2456_v20, %v2061_v19  ;;  %v1037_v48 = vor.u32 %v1036_v36, %v1035_v35  ;;  %v2282_v49 = vor.u32 %v2501_v40, %v2279_v42  ;;  %v2269_v51 = vld [vmem:[%s2867_s16 + $0x260] sm:$0xf]  ;;  %v2500_v52 = vld [vmem:[%s2867_s16 + $0x264] sm:$0xf0]  ;;  %v2499_v53 = vld [vmem:[%s2867_s16 + $0x264] sm:$0xf] }
  0xe7   : > { %1137 = vmatpush.bf16.msrb.mxu3 %v2178_v44  ;;  %v2474_v44 = vld [vmem:[%s2867_s16 + $0x194] sm:$0xf0]  ;;  %v2472_v57 = vld [vmem:[%s2867_s16 + $0x184] sm:$0xf0]  ;;  %v2270_v61 = vor.u32 %v2500_v52, %v2269_v51  ;;  %v2261_v2 = vld [vmem:[%s2867_s16 + $0x250] sm:$0xf] }
  0xe8   : > { %v2150_v50 = vor.u32 %v2474_v44, %v2149_v43  ;;  %v1038_v60 = vsel %vm1029_vm6, %v1032_v47, %v1037_v48  ;;  %v2498_v3 = vld [vmem:[%s2867_s16 + $0x254] sm:$0xf0]  ;;  %v2497_v4 = vld [vmem:[%s2867_s16 + $0x254] sm:$0xf]  ;;  %v2263_v5 = vld [vmem:[%s2867_s16 + $0x258] sm:$0xf0] }
  0xe9   : > { %984 = vmatpush.bf16.msrb.mxu0 %v2086_v54  ;;  %v2271_v54 = vld [vmem:[%s2867_s16 + $0x268] sm:$0xf0]  ;;  %v2262_v6 = vor.u32 %v2498_v3, %v2261_v2  ;;  %v2496_v9 = vld [vmem:[%s2867_s16 + $0x244] sm:$0xf0]  ;;  %v2495_v10 = vld [vmem:[%s2867_s16 + $0x244] sm:$0xf] }
  0xea   : > { %998 = vmatpush.bf16.msrb.mxu1 %v2090_v55  ;;  %1123 = vmatpush.bf16.msrb.mxu2 %v2174_v63  ;;  %v2141_v55 = vld [vmem:[%s2867_s16 + $0x180] sm:$0xf]  ;;  %v2274_v62 = vor.u32 %v2499_v53, %v2271_v54  ;;  %v2255_v11 = vld [vmem:[%s2867_s16 + $0x248] sm:$0xf0]  ;;  %v2245_v14 = vld [vmem:[%s2867_s16 + $0x230] sm:$0xf] }
  0xeb   : > { %1138 = vmatpush.bf16.msrb.mxu3 %v2170_v58  ;;  %v898_v58 = vsel %vm895_vm5, %v896_v28, %v897_v45  ;;  %v2142_v63 = vor.u32 %v2472_v57, %v2141_v55  ;;  %v2258_v13 = vor.u32 %v2495_v10, %v2255_v11  ;;  %v2494_v15 = vld [vmem:[%s2867_s16 + $0x234] sm:$0xf0]  ;;  %v2247_v19 = vld [vmem:[%s2867_s16 + $0x238] sm:$0xf0]  ;;  %v2237_v22 = vld [vmem:[%s2867_s16 + $0x220] sm:$0xf] }
  0xec   : > { %v2246_v20 = vor.u32 %v2494_v15, %v2245_v14  ;;  %v2229_v31 = vld [vmem:[%s2867_s16 + $0x210] sm:$0xf]  ;;  %v2490_v32 = vld [vmem:[%s2867_s16 + $0x214] sm:$0xf0]  ;;  %v2489_v33 = vld [vmem:[%s2867_s16 + $0x214] sm:$0xf] }
  0xed   : > { %985 = vmatpush.bf16.msrb.mxu0 %v2078_v7  ;;  %v2266_v7 = vor.u32 %v2497_v4, %v2263_v5  ;;  %v2231_v34 = vld [vmem:[%s2867_s16 + $0x218] sm:$0xf0]  ;;  %v2230_v35 = vor.u32 %v2490_v32, %v2229_v31  ;;  %v2488_v38 = vld [vmem:[%s2867_s16 + $0x204] sm:$0xf0]  ;;  %v2487_v39 = vld [vmem:[%s2867_s16 + $0x204] sm:$0xf] }
  0xee   : > { %999 = vmatpush.bf16.msrb.mxu1 %v2082_v8  ;;  %1124 = vmatpush.bf16.msrb.mxu2 %v2166_v16  ;;  %v2253_v8 = vld [vmem:[%s2867_s16 + $0x240] sm:$0xf]  ;;  %v2493_v16 = vld [vmem:[%s2867_s16 + $0x234] sm:$0xf]  ;;  %v2234_v36 = vor.u32 %v2489_v33, %v2231_v34  ;;  %v2223_v40 = vld [vmem:[%s2867_s16 + $0x208] sm:$0xf0] }
  0xef   : > { %1139 = vmatpush.bf16.msrb.mxu3 %v2162_v12  ;;  %v2254_v12 = vor.u32 %v2496_v9, %v2253_v8  ;;  %v2250_v21 = vor.u32 %v2493_v16, %v2247_v19  ;;  %v1170_v42 = vrot.slane %v3024_v17, 2  ;;  %v1171_v43 = vrot.slane %v3026_v18, 2  ;;  %v2343_v18 = vld [vmem:[%s2901_s0 + $0x70] sm:$0xf]  ;;  %v2517_v47 = vld [vmem:[%s2901_s0 + $0x74] sm:$0xf] }
  0xf0   : > { %v2226_v44 = vor.u32 %v2487_v39, %v2223_v40  ;;  %v2335_v53 = vld [vmem:[%s2901_s0 + $0x60] sm:$0xf]  ;;  %v2516_v54 = vld [vmem:[%s2901_s0 + $0x64] sm:$0xf0]  ;;  %v2515_v55 = vld [vmem:[%s2901_s0 + $0x64] sm:$0xf] }
  0xf1   : > { %986 = vmatpush.bf16.msrb.mxu0 %v2070_v23  ;;  %v2492_v23 = vld [vmem:[%s2867_s16 + $0x224] sm:$0xf0]  ;;  %v2513_v2 = vld [vmem:[%s2901_s0 + $0x54] sm:$0xf]  ;;  %v2329_v4 = vld [vmem:[%s2901_s0 + $0x58] sm:$0xf0] }
  0xf2   : > { %1000 = vmatpush.bf16.msrb.mxu1 %v2074_v24  ;;  %1125 = vmatpush.bf16.msrb.mxu2 %v2158_v37  ;;  %v2491_v24 = vld [vmem:[%s2867_s16 + $0x224] sm:$0xf]  ;;  %v2238_v29 = vor.u32 %v2492_v23, %v2237_v22  ;;  %v2221_v37 = vld [vmem:[%s2867_s16 + $0x200] sm:$0xf]  ;;  %v2332_v5 = vor.u32 %v2513_v2, %v2329_v4  ;;  %v2512_v8 = vld [vmem:[%s2901_s0 + $0x44] sm:$0xf0] }
  0xf3   : > { %1140 = vmatpush.bf16.msrb.mxu3 %v2154_v25  ;;  %v2239_v25 = vld [vmem:[%s2867_s16 + $0x228] sm:$0xf0]  ;;  %v2511_v9 = vld [vmem:[%s2901_s0 + $0x44] sm:$0xf]  ;;  %s3374_s16 = scalar_lea.vmem %s3341_s3, %s2888_s28  ;;  %v2509_v22 = vld [vmem:[%s2901_s0 + $0x34] sm:$0xf] }
  0xf4   : > { %v2242_v30 = vor.u32 %v2491_v24, %v2239_v25  ;;  %v3168_v19 = vld [vmem:[%s3374_s16] sm:$0x3]  ;;  %v2313_v24 = vld [vmem:[%s2901_s0 + $0x38] sm:$0xf0]  ;;  %v2508_v33 = vld [vmem:[%s2901_s0 + $0x24] sm:$0xf0] }
  0xf5   : > { %987 = vmatpush.bf16.msrb.mxu0 %v2062_v41  ;;  %v2222_v41 = vor.u32 %v2488_v38, %v2221_v37  ;;  %v2303_v32 = vld [vmem:[%s2901_s0 + $0x20] sm:$0xf]  ;;  %v2507_v34 = vld [vmem:[%s2901_s0 + $0x24] sm:$0xf]  ;;  %v2305_v37 = vld [vmem:[%s2901_s0 + $0x28] sm:$0xf0] }
  0xf6   : > { %1001 = vmatpush.bf16.msrb.mxu1 %v2066_v26  ;;  %1126 = vmatpush.bf16.msrb.mxu2 %v2150_v50  ;;  %v1172_v26 = vsel %vm1169_vm7, %v1170_v42, %v1171_v43  ;;  %v2308_v40 = vor.u32 %v2507_v34, %v2305_v37  ;;  %v2506_v42 = vld [vmem:[%s2901_s0 + $0x14] sm:$0xf0]  ;;  %v2505_v43 = vld [vmem:[%s2901_s0 + $0x14] sm:$0xf] }
  0xf7   : > { %1141 = vmatpush.bf16.msrb.mxu3 %v2146_v27 }
  0xf8   : > { %988 = vmatmul.bf16.vlgmr.msrb.gmra.mxu0 %v898_v58 }
  0xf9   : > { %1254 = vmatpush.bf16.msra.mxu0 %v2278_v46  ;;  %1002 = vmatmul.bf16.vlgmr.msrb.gmra.mxu1 %v898_v58  ;;  %v2518_v46 = vld [vmem:[%s2901_s0 + $0x74] sm:$0xf0]  ;;  %v2336_v58 = vor.u32 %v2516_v54, %v2335_v53 }
  0xfa   : > { %1268 = vmatpush.bf16.msra.mxu1 %v2282_v49  ;;  %1142 = vmatmul.bf16.vlgmr.msrb.gmra.mxu3 %v1038_v60  ;;  %v2344_v48 = vor.u32 %v2518_v46, %v2343_v18  ;;  %v2345_v49 = vld [vmem:[%s2901_s0 + $0x78] sm:$0xf0] }
  0xfb   : > { %1127 = vmatpush.bf16.msrb.mxu2 %v2142_v63  ;;  %v2348_v50 = vor.u32 %v2517_v47, %v2345_v49  ;;  %v2514_v63 = vld [vmem:[%s2901_s0 + $0x54] sm:$0xf0]  ;;  %v2287_v47 = vld [vmem:[%s2901_s0] sm:$0xf] }
  0xfd   : > { %1255 = vmatpush.bf16.msra.mxu0 %v2270_v61  ;;  %1455 = vmatpush.bf16.msra.mxu3 %v2348_v50  ;;  %v2503_v50 = vld [vmem:[%s2901_s0 + $0x4] sm:$0xf] }
  0xfe   : > { %1269 = vmatpush.bf16.msra.mxu1 %v2274_v62  ;;  %1128 = vmatmul.bf16.vlgmr.msrb.gmra.mxu2 %v1038_v60  ;;  %v2337_v60 = vld [vmem:[%s2901_s0 + $0x68] sm:$0xf0]  ;;  %v2327_v62 = vld [vmem:[%s2901_s0 + $0x50] sm:$0xf] }
  0xff   : > { %1441 = vmatpush.bf16.msra.mxu2 %v2344_v48  ;;  %v2340_v61 = vor.u32 %v2515_v55, %v2337_v60  ;;  %v2328_v3 = vor.u32 %v2514_v63, %v2327_v62  ;;  %v2504_v48 = vld [vmem:[%s2901_s0 + $0x4] sm:$0xf0] }
 0x100   : > { %v2288_v55 = vor.u32 %v2504_v48, %v2287_v47 }
 0x101   : > { %1256 = vmatpush.bf16.msra.mxu0 %v2262_v6  ;;  %1456 = vmatpush.bf16.msra.mxu3 %v2340_v61 }
 0x102   : > { %1270 = vmatpush.bf16.msra.mxu1 %v2266_v7  ;;  %v2319_v7 = vld [vmem:[%s2901_s0 + $0x40] sm:$0xf] }
 0x103   : > { %1442 = vmatpush.bf16.msra.mxu2 %v2336_v58  ;;  %v2320_v11 = vor.u32 %v2512_v8, %v2319_v7 }
 0x105   : > { %1257 = vmatpush.bf16.msra.mxu0 %v2254_v12  ;;  %1457 = vmatpush.bf16.msra.mxu3 %v2332_v5  ;;  %v2321_v12 = vld [vmem:[%s2901_s0 + $0x48] sm:$0xf0]  ;;  %v2737_v5 = vmov 0  }
 0x106   : > { %1271 = vmatpush.bf16.msra.mxu1 %v2258_v13  ;;  %v2324_v15 = vor.u32 %v2511_v9, %v2321_v12  ;;  %2617 = vset.pattern.permute.xlu0 %v2737_v5 }
 0x107   : > { %1443 = vmatpush.bf16.msra.mxu2 %v2328_v3  ;;  %1473 = vperm.xlu0 %2617, %v2890_v0   ;;  %v1288_v0 = vperm.slane %v3168_v19, 0 }
 0x109   : > { %1258 = vmatpush.bf16.msra.mxu0 %v2246_v20  ;;  %1458 = vmatpush.bf16.msra.mxu3 %v2324_v15  ;;  %v2311_v20 = vld [vmem:[%s2901_s0 + $0x30] sm:$0xf] }
 0x10a   : > { %1272 = vmatpush.bf16.msra.mxu1 %v2250_v21  ;;  %v2510_v21 = vld [vmem:[%s2901_s0 + $0x34] sm:$0xf0] }
 0x10b   : > { %1444 = vmatpush.bf16.msra.mxu2 %v2320_v11  ;;  %v2312_v23 = vor.u32 %v2510_v21, %v2311_v20 }
 0x10d   : > { %1259 = vmatpush.bf16.msra.mxu0 %v2238_v29  ;;  %v2316_v29 = vor.u32 %v2509_v22, %v2313_v24 }
 0x10e   : > { %1273 = vmatpush.bf16.msra.mxu1 %v2242_v30  ;;  %v1289_v30 = vperm.slane %v3168_v19, 1 }
 0x10f   : > { %1445 = vmatpush.bf16.msra.mxu2 %v2312_v23  ;;  %1459 = vmatpush.bf16.msra.mxu3 %v2316_v29 }
 0x110   : > { %1478 = vperm.xlu0 %2617, %v2892_v1  }
 0x111   : > { %1260 = vmatpush.bf16.msra.mxu0 %v2230_v35 }
 0x112   : > { %1274 = vmatpush.bf16.msra.mxu1 %v2234_v36  ;;  %v2304_v36 = vor.u32 %v2508_v33, %v2303_v32 }
 0x113   : > { %1460 = vmatpush.bf16.msra.mxu3 %v2308_v40 }
 0x114   : > { %1446 = vmatpush.bf16.msra.mxu2 %v2304_v36 }
 0x115   : > { %1261 = vmatpush.bf16.msra.mxu0 %v2222_v41  ;;  %v2295_v41 = vld [vmem:[%s2901_s0 + $0x10] sm:$0xf] }
 0x116   : > { %1275 = vmatpush.bf16.msra.mxu1 %v2226_v44  ;;  %v2296_v44 = vor.u32 %v2506_v42, %v2295_v41 }
 0x118   : > { %1262 = vmatmul.bf16.vlgmr.msra.gmra.mxu0 %v1172_v26  ;;  %1447 = vmatpush.bf16.msra.mxu2 %v2296_v44 }
 0x119   : > { %1276 = vmatmul.bf16.vlgmr.msra.gmra.mxu1 %v1172_v26  ;;  %v2297_v26 = vld [vmem:[%s2901_s0 + $0x18] sm:$0xf0] }
 0x11a   : > { %v2300_v46 = vor.u32 %v2505_v43, %v2297_v26 }
 0x11c   : > { %1461 = vmatpush.bf16.msra.mxu3 %v2300_v46  ;;  %1448 = vmatpush.bf16.msra.mxu2 %v2288_v55 }
 0x15c   : > { %v763_v27 = vpop.f32.mrf.mxu1 }
 0x15d   : > { %v3139_v45 = vpop.f32.mrf.mxu0 }
 0x15f   : > { %v871_v17 = vpop.f32.mrf.mxu3 }
 0x160   : > { %v3155_v6 = vpop.f32.mrf.mxu2  ;;  %v872_v13 = vadd.f32 %v871_v17, %v763_v27 }
 0x161   : > { %v858_v7 = vadd.f32 %v3155_v6, %v3139_v45 }
 0x164   : > { %v3137_v28 = vpop.f32.mrf.mxu1 }
 0x165   : > { %v3145_v52 = vpop.f32.mrf.mxu0 }
 0x167   : > { %v873_v57 = vpop.f32.mrf.mxu3 }
 0x168   : > { %v859_v38 = vpop.f32.mrf.mxu2  ;;  %v874_v27 = vadd.f32 %v873_v57, %v3137_v28 }
 0x169   : > { %v860_v8 = vadd.f32 %v859_v38, %v3145_v52 }
 0x175   : > { %v3161_v14 = vpop.f32.mrf.mxu0 }
 0x176   : > { %v1003_v51 = vpop.f32.mrf.mxu1  ;;  %v1008_v9 = vadd.f32 %v3161_v14, %v858_v7 }
 0x177   : > { %v1009_v25 = vadd.f32 %v1003_v51, %v872_v13  ;;  %v2289_v51 = vld [vmem:[%s2901_s0 + $0x8] sm:$0xf0] }
 0x178   : > { %v2292_v60 = vor.u32 %v2503_v50, %v2289_v51 }
 0x17a   : > { %1462 = vmatpush.bf16.msra.mxu3 %v2292_v60 }
 0x17d   : > { %v1143_v16 = vpop.f32.mrf.mxu3  ;;  %v991_v17 = vpop.f32.mrf.mxu0 }
 0x17e   : > { %v1005_v10 = vpop.f32.mrf.mxu1  ;;  %v1149_v31 = vadd.f32 %v1143_v16, %v1009_v25 }
 0x17f   : > { %v1011_v53 = vadd.f32 %v1005_v10, %v874_v27  ;;  %v1010_v10 = vadd.f32 %v991_v17, %v860_v8  ;;  %v1355_v17 = vld [vmem:[%s2906_s27] sm:$0x3] }
 0x180   : > { %v1358_v46 = vperm.slane %v1355_v17, 1 }
 0x181   : > { %v1129_v28 = vpop.f32.mrf.mxu2 }
 0x182   : > { %v1148_v16 = vadd.f32 %v1129_v28, %v1008_v9 }
 0x185   : > { %v1145_v49 = vpop.f32.mrf.mxu3 }
 0x186   : > { %v1151_v58 = vadd.f32 %v1145_v49, %v1011_v53  ;;  %v1485_v49 = vld [vmem:[#allocation3 + $0x8] sm:$0xff]  ;;  %v3196_v53 = vpop.permute.xlu0 %1473 }
 0x189   : > { %v1131_v12 = vpop.f32.mrf.mxu2 }
 0x18a   : > { %v1150_v22 = vadd.f32 %v1131_v12, %v1010_v10 }
 0x195   : > { %v1263_v2 = vpop.f32.mrf.mxu0 }
 0x196   : > { %v1277_v35 = vpop.f32.mrf.mxu1  ;;  %v1282_v45 = vadd.f32 %v1263_v2, %v1148_v16 }
 0x197   : > { %v1283_v39 = vadd.f32 %v1277_v35, %v1149_v31 }
 0x198   : > { %v1292_v24 = vadd.f32 %v1288_v0, %v1282_v45 }
 0x199   : > { %v1293_v18 = vadd.f32 %v1289_v30, %v1283_v39 }
 0x19b   : > { %v2283_v54 = vmul.f32 -1.442695, %v1293_v18  ;;  %v1357_v18 = vperm.slane %v1355_v17, 0 }
 0x19d   : > { %2618 = vpow2.f32 %v2283_v54  ;;  %v1265_v21 = vpop.f32.mrf.mxu0 }
 0x19e   : > { %v1279_v61 = vpop.f32.mrf.mxu1  ;;  %v1284_v52 = vadd.f32 %v1265_v21, %v1150_v22 }
 0x19f   : > { %v1285_v62 = vadd.f32 %v1279_v61, %v1151_v58 }
 0x1a0   : > { %v1294_v25 = vadd.f32 %v1288_v0, %v1284_v52 }
 0x1a1   : > { %v1295_v57 = vadd.f32 %v1289_v30, %v1285_v62  ;;  %v1486_v62 = vld [vmem:[#allocation3] sm:$0xff] }
 0x1a3   : > { %v2619_v63 = vpop.eup %2618  ;;  %v2284_v3 = vmul.f32 -1.442695, %v1295_v57 }
 0x1a4   : > { %v1304_v4 = vadd.f32 1.0, %v2619_v63 }
 0x1a5   : > { %2620 = vpow2.f32 %v2284_v3  ;;  %v3201_v3 = vpop.permute.xlu0 %1478 }
 0x1a6   : > { %2622 = vrcp.f32 %v1304_v4  ;;  %v1317_v31 = vand.u32 2147483648, %v1304_v4  ;;  %vm1311_vm9 = vweird.f32 %v1304_v4  ;;  %v1315_v33 = vand.u32 2147483647, %v1304_v4 }
 0x1a8   : > { %v1318_v36 = vor.u32 1.1754944e-38, %v1317_v31  ;;  %vm1316_vm12 = vcmp.eq.f32.partialorder %v1315_v33, 8.507059e+37 }
 0x1ab   : > { %v2621_v11 = vpop.eup %2620 }
 0x1ac   : > { %v2623_v13 = vpop.eup %2622  ;;  %v1305_v15 = vadd.f32 1.0, %v2621_v11 }
 0x1ad   : > { %v1307_v20 = vmul.f32 %v2623_v13, %v1304_v4  ;;  %vm1312_vm8 = vweird.f32 %v2623_v13 }
 0x1ae   : > { %2624 = vrcp.f32 %v1305_v15  ;;  %vm1313_vm10 = vmor %vm1311_vm9, %vm1312_vm8  ;;  %v1332_v1 = vand.u32 2147483648, %v1305_v15  ;;  %v1330_v19 = vand.u32 2147483647, %v1305_v15  ;;  %vm1326_vm13 = vweird.f32 %v1305_v15 }
 0x1af   : > { %v1308_v6 = vsub.f32 1.0, %v1307_v20  ;;  %2626 = vtanh.f32 %v1292_v24 }
 0x1b0   : > { %2628 = vtanh.f32 %v1294_v25  ;;  %v1333_v39 = vor.u32 1.1754944e-38, %v1332_v1  ;;  %vm1331_vm15 = vcmp.eq.f32.partialorder %v1330_v19, 8.507059e+37 }
 0x1b1   : > { %v1309_v23 = vmul.f32 %v2623_v13, %v1308_v6 }
 0x1b3   : > { %v1310_v30 = vadd.f32 %v2623_v13, %v1309_v23 }
 0x1b4   : > { %v2625_v14 = vpop.eup %2624 }
 0x1b5   : > { %v1322_v29 = vmul.f32 %v2625_v14, %v1305_v15  ;;  %v1314_v34 = vsel %vm1313_vm10, %v2623_v13, %v1310_v30  ;;  %vm1327_vm11 = vweird.f32 %v2625_v14  ;;  %v2627_v40 = vpop.eup %2626 }
 0x1b6   : > { %v1319_v38 = vsel %vm1316_vm12, %v1318_v36, %v1314_v34  ;;  %vm1328_vm14 = vmor %vm1326_vm13, %vm1327_vm11  ;;  %v2629_v42 = vpop.eup %2628 }
 0x1b7   : > { %v1323_v32 = vsub.f32 1.0, %v1322_v29  ;;  %v1336_v44 = vmul.f32 %v2627_v40, %v1319_v38 }
 0x1b9   : > { %v1324_v35 = vmul.f32 %v2625_v14, %v1323_v32 }
 0x1bb   : > { %v1325_v37 = vadd.f32 %v2625_v14, %v1324_v35 }
 0x1bd   : > { %v1329_v41 = vsel %vm1328_vm14, %v2625_v14, %v1325_v37 }
 0x1be   : > { %v1334_v43 = vsel %vm1331_vm15, %v1333_v39, %v1329_v41 }
 0x1bf   : > { %v1337_v26 = vmul.f32 %v2629_v42, %v1334_v43 }
 0x1c1   : > { %v1338_v27 = vpack.c.bf16 %v1337_v26, %v1336_v44 }
 0x1c3   : > { %1449 = vmatmul.bf16.vlgmr.msra.gmra.mxu2 %v1338_v27  ;;  %1463 = vmatmul.bf16.vlgmr.msra.gmra.mxu3 %v1338_v27 }
 0x246   : > { %v1450_v47 = vpop.f32.mrf.mxu2  ;;  %v1464_v48 = vpop.f32.mrf.mxu3 }
 0x247   : > { %v1451_v50 = vadd.f32 %v1450_v47, %v1357_v18  ;;  %v1465_v51 = vadd.f32 %v1464_v48, %v1358_v46 }
 0x249   : > { %v1469_v54 = vadd.f32 %v1451_v50, %v3000_v56  ;;  %v1487_v55 = vadd.f32 %v1485_v49, %v1465_v51 }
 0x24b   : > { %v1481_v58 = vmul.f32 %v3196_v53, %v1469_v54  ;;  %1489 = vst [vmem:[#allocation3 + $0x8] sm:$0xff] %v1487_v55 }
 0x24d   : > { %1483 = vst [vmem:[#allocation2] sm:$0xff] %v1481_v58 }
 0x24e   : > { %v1452_v60 = vpop.f32.mrf.mxu2  ;;  %v1466_v61 = vpop.f32.mrf.mxu3 }
 0x24f   : > { %v1453_v28 = vadd.f32 %v1452_v60, %v1357_v18  ;;  %v1467_v57 = vadd.f32 %v1466_v61, %v1358_v46 }
 0x251   : > { %v1470_v63 = vadd.f32 %v1453_v28, %v3004_v59  ;;  %v1488_v2 = vadd.f32 %v1486_v62, %v1467_v57  ;;  %1494 = sbr.rel (%p2349_p3) target bundleno = 782 (0x30e), region = 68 }
 0x253   : > { %v1482_v4 = vmul.f32 %v3201_v3, %v1470_v63  ;;  %1490 = vst [vmem:[#allocation3] sm:$0xff] %v1488_v2 }
 0x255   : > { %1484 = vst [vmem:[#allocation2 + $0x8] sm:$0xff] %v1482_v4 }
 0x256   : > { %v2533_v56 = vld [vmem:[%s3345_s7 + $0x74] sm:$0xf]  ;;  %v2410_v5 = vld [vmem:[%s3345_s7 + $0x78] sm:$0xf0]  ;;  %v2408_v59 = vld [vmem:[%s3345_s7 + $0x70] sm:$0xf] }
 0x257   : > { %v2413_v7 = vor.u32 %v2533_v56, %v2410_v5  ;;  %v2534_v8 = vld [vmem:[%s3345_s7 + $0x74] sm:$0xf0]  ;;  %v2531_v9 = vld [vmem:[%s3345_s7 + $0x64] sm:$0xf]  ;;  %v2402_v10 = vld [vmem:[%s3345_s7 + $0x68] sm:$0xf0] }
 0x258   : > { %v2409_v11 = vor.u32 %v2534_v8, %v2408_v59  ;;  %v2400_v12 = vld [vmem:[%s3345_s7 + $0x60] sm:$0xf]  ;;  %v2532_v13 = vld [vmem:[%s3345_s7 + $0x64] sm:$0xf0]  ;;  %v2405_v15 = vor.u32 %v2531_v9, %v2402_v10  ;;  %v2529_v20 = vld [vmem:[%s3345_s7 + $0x54] sm:$0xf] }
 0x259   : > { %1616 = vmatpush.bf16.msra.mxu1 %v2413_v7  ;;  %v2401_v16 = vor.u32 %v2532_v13, %v2400_v12  ;;  %v2394_v21 = vld [vmem:[%s3345_s7 + $0x58] sm:$0xf0]  ;;  %v2392_v22 = vld [vmem:[%s3345_s7 + $0x50] sm:$0xf]  ;;  %v2530_v45 = vld [vmem:[%s3345_s7 + $0x54] sm:$0xf0] }
 0x25a   : > { %1602 = vmatpush.bf16.msra.mxu0 %v2409_v11  ;;  %v2397_v0 = vor.u32 %v2529_v20, %v2394_v21  ;;  %v2393_v6 = vor.u32 %v2530_v45, %v2392_v22  ;;  %v2527_v52 = vld [vmem:[%s3345_s7 + $0x44] sm:$0xf]  ;;  %v2386_v23 = vld [vmem:[%s3345_s7 + $0x48] sm:$0xf0]  ;;  %v2384_v24 = vld [vmem:[%s3345_s7 + $0x40] sm:$0xf] }
 0x25b   : > { %v2528_v14 = vld [vmem:[%s3345_s7 + $0x44] sm:$0xf0]  ;;  %v2389_v25 = vor.u32 %v2527_v52, %v2386_v23  ;;  %v2525_v30 = vld [vmem:[%s3345_s7 + $0x34] sm:$0xf]  ;;  %v2378_v31 = vld [vmem:[%s3345_s7 + $0x38] sm:$0xf0] }
 0x25c   : > { %v2385_v29 = vor.u32 %v2528_v14, %v2384_v24  ;;  %v2376_v32 = vld [vmem:[%s3345_s7 + $0x30] sm:$0xf]  ;;  %v2526_v33 = vld [vmem:[%s3345_s7 + $0x34] sm:$0xf0]  ;;  %v2381_v1 = vor.u32 %v2525_v30, %v2378_v31  ;;  %v2523_v35 = vld [vmem:[%s3345_s7 + $0x24] sm:$0xf] }
 0x25d   : > { %1617 = vmatpush.bf16.msra.mxu1 %v2405_v15  ;;  %v2377_v34 = vor.u32 %v2526_v33, %v2376_v32  ;;  %v2370_v19 = vld [vmem:[%s3345_s7 + $0x28] sm:$0xf0]  ;;  %v2368_v36 = vld [vmem:[%s3345_s7 + $0x20] sm:$0xf]  ;;  %v2524_v37 = vld [vmem:[%s3345_s7 + $0x24] sm:$0xf0] }
 0x25e   : > { %1603 = vmatpush.bf16.msra.mxu0 %v2401_v16  ;;  %v2373_v38 = vor.u32 %v2523_v35, %v2370_v19  ;;  %v2369_v39 = vor.u32 %v2524_v37, %v2368_v36  ;;  %v2521_v40 = vld [vmem:[%s3345_s7 + $0x14] sm:$0xf]  ;;  %v2362_v41 = vld [vmem:[%s3345_s7 + $0x18] sm:$0xf0]  ;;  %v2360_v42 = vld [vmem:[%s3345_s7 + $0x10] sm:$0xf] }
 0x25f   : > { %v2522_v43 = vld [vmem:[%s3345_s7 + $0x14] sm:$0xf0]  ;;  %v2365_v44 = vor.u32 %v2521_v40, %v2362_v41  ;;  %v1496_v27 = vld [vmem:[#allocation3] sm:$0xff]  ;;  %v2519_v18 = vld [vmem:[%s3345_s7 + $0x4] sm:$0xf] }
 0x260   : > { %v1495_v26 = vld [vmem:[#allocation3 + $0x8] sm:$0xff]  ;;  %v2361_v17 = vor.u32 %v2522_v43, %v2360_v42  ;;  %v2354_v46 = vld [vmem:[%s3345_s7 + $0x8] sm:$0xf0]  ;;  %v2352_v47 = vld [vmem:[%s3345_s7] sm:$0xf]  ;;  %v1498_v50 = vmul.f32 %v1496_v27, %v3201_v3 }
 0x261   : > { %1618 = vmatpush.bf16.msra.mxu1 %v2397_v0  ;;  %v2520_v48 = vld [vmem:[%s3345_s7 + $0x4] sm:$0xf0]  ;;  %v1497_v49 = vmul.f32 %v1495_v26, %v3196_v53  ;;  %v2357_v51 = vor.u32 %v2519_v18, %v2354_v46  ;;  %v1516_v58 = vld [vmem:[%s3375_s23] sm:$0x3] }
 0x262   : > { %1604 = vmatpush.bf16.msra.mxu0 %v2393_v6  ;;  %v2353_v54 = vor.u32 %v2520_v48, %v2352_v47  ;;  %v1519_v60 = vperm.slane %v1516_v58, 1  ;;  %v1518_v53 = vperm.slane %v1516_v58, 0  ;;  %v1634_v3 = vld [vmem:[%s2886_s29] sm:$0xff]  ;;  %v1635_v10 = vld [vmem:[%s2886_s29 + $0x8] sm:$0xff] }
 0x263   : > { %v1499_v55 = vpack.c.bf16 %v1498_v50, %v1497_v49 }
 0x265   : > { %1619 = vmatpush.bf16.msra.mxu1 %v2389_v25 }
 0x266   : > { %1605 = vmatpush.bf16.msra.mxu0 %v2385_v29 }
 0x269   : > { %1620 = vmatpush.bf16.msra.mxu1 %v2381_v1 }
 0x26a   : > { %1606 = vmatpush.bf16.msra.mxu0 %v2377_v34 }
 0x26d   : > { %1621 = vmatpush.bf16.msra.mxu1 %v2373_v38 }
 0x26e   : > { %1607 = vmatpush.bf16.msra.mxu0 %v2369_v39 }
 0x271   : > { %1622 = vmatpush.bf16.msra.mxu1 %v2365_v44 }
 0x272   : > { %1608 = vmatpush.bf16.msra.mxu0 %v2361_v17 }
 0x275   : > { %1623 = vmatpush.bf16.msra.mxu1 %v2357_v51 }
 0x276   : > { %1609 = vmatpush.bf16.msra.mxu0 %v2353_v54 }
 0x278   : > { %1624 = vmatmul.bf16.vlgmr.msra.gmra.mxu1 %v1499_v55 }
 0x279   : > { %1610 = vmatmul.bf16.vlgmr.msra.gmra.mxu0 %v1499_v55 }
 0x2f5   : > { %v1625_v61 = vpop.f32.mrf.mxu1 }
 0x2f6   : > { %v1626_v62 = vadd.f32 %v1625_v61, %v1519_v60  ;;  %v1611_v28 = vpop.f32.mrf.mxu0 }
 0x2f7   : > { %v1612_v57 = vadd.f32 %v1611_v28, %v1518_v53 }
 0x2f8   : > { %1632 = vst [vmem:[%s2921_s25] sm:$0xff] %v1626_v62  ;;  %v1636_v63 = vmul.f32 1.442695, %v1626_v62 }
 0x2f9   : > { %1630 = vst [vmem:[%s2916_s21] sm:$0xff] %v1612_v57 }
 0x2fa   : > { %2630 = vpow2.f32 %v1636_v63 }
 0x2fd   : > { %v1627_v2 = vpop.f32.mrf.mxu1 }
 0x2fe   : > { %v1628_v4 = vadd.f32 %v1627_v2, %v1519_v60  ;;  %v1613_v56 = vpop.f32.mrf.mxu0 }
 0x2ff   : > { %v1614_v5 = vadd.f32 %v1613_v56, %v1518_v53 }
 0x300   : > { %v2631_v59 = vpop.eup %2630  ;;  %1633 = vst [vmem:[%s2921_s25 + $0x8] sm:$0xff] %v1628_v4  ;;  %v1638_v7 = vmul.f32 1.442695, %v1628_v4 }
 0x301   : > { %v1640_v8 = vmul.f32 %v2631_v59, %v1634_v3  ;;  %1631 = vst [vmem:[%s2916_s21 + $0x8] sm:$0xff] %v1614_v5 }
 0x302   : > { %2632 = vpow2.f32 %v1638_v7 }
 0x303   : > { %v1642_v9 = vadd.f32 %v1640_v8, %v1612_v57 }
 0x305   : > { %1644 = vst [vmem:[%s2911_s2] sm:$0xff] %v1642_v9 }
 0x308   : > { %v2633_v11 = vpop.eup %2632 }
 0x309   : > { %v1641_v12 = vmul.f32 %v2633_v11, %v1635_v10 }
 0x30b   : > { %v1643_v13 = vadd.f32 %v1641_v12, %v1614_v5 }
 0x30d   : > { %1645 = vst [vmem:[%s2911_s2 + $0x8] sm:$0xff] %v1643_v13 }
 0x30e PF: > { %s25_s24 = sadd.s32 1, %s2730_s24   ;;  %s3376_s15 = sld [smem:[#allocation7_spill]] }
 0x30f   : > { %p22_p4 = scmp.ge.s32.totalorder %s25_s24, 8   ;;  %s3377_s19 = sld [smem:[#allocation12_spill]] }
 0x310   : > { %s3378_s20 = sld [smem:[#allocation8_spill]]  ;;  %s3382_s17 = smov %s2706_s18 }
 0x311   : > { %s3379_s21 = sld [smem:[#allocation9_spill]]  ;;  %24 = sbr.rel (!%p22_p4) target bundleno = 11 (0xb), region = 150 }
 0x312   : > { %s3380_s22 = sld [smem:[#allocation10_spill]] }
 0x313   : > { %s3381_s23 = sld [smem:[#allocation11_spill]] }
 0x314   : > { %s3383_s18 = smov %s3376_s15 }
 0x316   :  { %1699 = vsyncpa [#allocation5], 1 }
 0x317   :  { %1701 = vsyncpa [#allocation5 + $0x1], 1 }

</bundles_post_ra>
